<compile_context>
chip_gen: v5e
topology: v5e:2x2
jax: 0.10.0
libtpu: 0.0.40
codegen_flags: <defaults>
</compile_context>

<pallas_src>
import functools

import jax
import jax.numpy as jnp
from jax.experimental import pallas as pl
from jax.experimental.pallas import tpu as pltpu


def _linkpred_kernel_lane_dense(xi_ref, xj_ref,
                                w1_ref, b1_ref,
                                w2_ref, b2_ref,
                                w3_ref, b3_ref,
                                o_ref):
    """out_channels == 1 path: lane-dense (1, block_n) output block."""
    # Hadamard product of endpoint embeddings (VPU, f32).
    x = xi_ref[...].astype(jnp.float32) * xj_ref[...].astype(jnp.float32)

    # Layer 1: Linear + ReLU (MXU matmul, operands in w1_ref.dtype, f32 acc).
    h = jnp.dot(x.astype(w1_ref.dtype), w1_ref[...],
                preferred_element_type=jnp.float32) + b1_ref[...]
    h = jnp.maximum(h, 0.0)

    # Layer 2: Linear + ReLU.
    h = jnp.dot(h.astype(w2_ref.dtype), w2_ref[...],
                preferred_element_type=jnp.float32) + b2_ref[...]
    h = jnp.maximum(h, 0.0)

    # Output layer (out_channels == 1): VPU multiply + cross-lane reduce (XLU)
    # instead of a 1-wide MXU matmul; result lands lane-dense as (1, block_n).
    z = jnp.sum(h * w3_ref[...], axis=-1)          # (block_n,)
    z = z[None, :] + b3_ref[...]                   # (1, block_n)
    o_ref[...] = jax.nn.sigmoid(z).astype(o_ref.dtype)


def _linkpred_kernel_general(xi_ref, xj_ref,
                             w1_ref, b1_ref,
                             w2_ref, b2_ref,
                             w3_ref, b3_ref,
                             o_ref):
    """General out_channels > 1 path: (block_n, O) output block."""
    x = xi_ref[...].astype(jnp.float32) * xj_ref[...].astype(jnp.float32)

    h = jnp.dot(x.astype(w1_ref.dtype), w1_ref[...],
                preferred_element_type=jnp.float32) + b1_ref[...]
    h = jnp.maximum(h, 0.0)

    h = jnp.dot(h.astype(w2_ref.dtype), w2_ref[...],
                preferred_element_type=jnp.float32) + b2_ref[...]
    h = jnp.maximum(h, 0.0)

    z = jnp.dot(h.astype(w3_ref.dtype), w3_ref[...],
                preferred_element_type=jnp.float32) + b3_ref[...]
    o_ref[...] = jax.nn.sigmoid(z).astype(o_ref.dtype)


@functools.partial(jax.jit, static_argnames=("block_n", "matmul_dtype"))
def link_predictor(x_i, x_j, params, *, block_n=512, matmul_dtype=jnp.bfloat16):
    w1, b1, w2, b2, w3, b3 = params
    N, C = x_i.shape
    H = w1.shape[1]
    O = w3.shape[1]

    # block_n must keep the lane-dense output block a multiple of 128 lanes and
    # the (N, C) feature blocks a multiple of 8 sublanes.
    block_n = max(128, ((block_n + 127) // 128) * 128)

    # Matmul-operand dtype (weights cast once in the wrapper; kernel casts
    # activations to match). f32 accumulation is kept inside the kernel.
    w1m = w1.astype(matmul_dtype)
    w2m = w2.astype(matmul_dtype)

    # Pad N up to a multiple of block_n (tail rows are junk-but-finite and
    # sliced off below) so the tile size never has to shrink to divide N.
    num_blocks = pl.cdiv(N, block_n)
    n_pad = num_blocks * block_n
    if n_pad != N:
        x_i = jnp.pad(x_i, ((0, n_pad - N), (0, 0)))
        x_j = jnp.pad(x_j, ((0, n_pad - N), (0, 0)))

    feat_spec = pl.BlockSpec((block_n, C), lambda i: (i, 0))
    # Weights / biases: full arrays, same block every grid step (fetched once).
    w1_spec = pl.BlockSpec((C, H), lambda i: (0, 0))
    b1_spec = pl.BlockSpec((1, H), lambda i: (0, 0))
    w2_spec = pl.BlockSpec((H, H), lambda i: (0, 0))
    b2_spec = pl.BlockSpec((1, H), lambda i: (0, 0))

    if O == 1:
        # Lane-dense output: logical shape (1, n_pad), one (1, block_n) row
        # block per grid step. Final-layer weight passed as a (1, H) row.
        w3_arg = w3.reshape(1, H).astype(jnp.float32)
        w3_spec = pl.BlockSpec((1, H), lambda i: (0, 0))
        b3_spec = pl.BlockSpec((1, 1), lambda i: (0, 0))
        out_shape = jax.ShapeDtypeStruct((1, n_pad), jnp.float32)
        out_spec = pl.BlockSpec((1, block_n), lambda i: (0, i))
        kernel = _linkpred_kernel_lane_dense
    else:
        w3_arg = w3.astype(matmul_dtype)
        w3_spec = pl.BlockSpec((H, O), lambda i: (0, 0))
        b3_spec = pl.BlockSpec((1, O), lambda i: (0, 0))
        out_shape = jax.ShapeDtypeStruct((n_pad, O), jnp.float32)
        out_spec = pl.BlockSpec((block_n, O), lambda i: (i, 0))
        kernel = _linkpred_kernel_general

    out = pl.pallas_call(
        kernel,
        out_shape=out_shape,
        grid_spec=pltpu.PrefetchScalarGridSpec(
            num_scalar_prefetch=0,
            grid=(num_blocks,),
            in_specs=[feat_spec, feat_spec,
                      w1_spec, b1_spec,
                      w2_spec, b2_spec,
                      w3_spec, b3_spec],
            out_specs=out_spec,
        ),
        compiler_params=pltpu.CompilerParams(
            dimension_semantics=("parallel",)),
    )(x_i, x_j, w1m, b1, w2m, b2, w3_arg, b3)

    if O == 1:
        return out[0, :N].reshape(N, 1)
    return out[:N]


def init_params(key, in_channels, hidden_channels, out_channels):
    """PyTorch nn.Linear-style init: U(-1/sqrt(fan_in), 1/sqrt(fan_in))."""
    def linear(key, fan_in, fan_out):
        kw, kb = jax.random.split(key)
        bound = 1.0 / jnp.sqrt(fan_in)
        w = jax.random.uniform(kw, (fan_in, fan_out), jnp.float32, -bound, bound)
        b = jax.random.uniform(kb, (1, fan_out), jnp.float32, -bound, bound)
        return w, b

    k1, k2, k3 = jax.random.split(key, 3)
    w1, b1 = linear(k1, in_channels, hidden_channels)
    w2, b2 = linear(k2, hidden_channels, hidden_channels)
    w3, b3 = linear(k3, hidden_channels, out_channels)
    return (w1, b1, w2, b2, w3, b3)


def link_predictor_ref(x_i, x_j, params):
    w1, b1, w2, b2, w3, b3 = params
    x = x_i * x_j
    x = jax.nn.relu(x @ w1 + b1)
    x = jax.nn.relu(x @ w2 + b2)
    return jax.nn.sigmoid(x @ w3 + b3)


if __name__ == "__main__":
    # Shapes implied by the module: num_layers=3, dropout=0.5 (inactive at eval).
    N = 1000          # number of edge pairs (non-multiple of block_n: exercises padding)
    IN_CH = 32        # in_channels
    HID = 32          # hidden_channels
    OUT_CH = 1        # out_channels (link probability)

    key = jax.random.PRNGKey(0)
    kx, kp = jax.random.split(key)
    kxi, kxj = jax.random.split(kx)

    x_i = jax.random.normal(kxi, (N, IN_CH), jnp.float32)
    x_j = jax.random.normal(kxj, (N, IN_CH), jnp.float32)
    params = init_params(kp, IN_CH, HID, OUT_CH)
    ref = link_predictor_ref(x_i, x_j, params)

    # 1) Fast path: bf16 matmul operands (MXU-native), lane-dense output.
    out_bf16 = jax.block_until_ready(
        link_predictor(x_i, x_j, params, block_n=256, matmul_dtype=jnp.bfloat16))
    assert out_bf16.shape == (N, OUT_CH)
    assert jnp.allclose(out_bf16, ref, atol=3e-2), float(jnp.max(jnp.abs(out_bf16 - ref)))

    # 2) f32 matmul path: tight check against the reference.
    out_f32 = jax.block_until_ready(
        link_predictor(x_i, x_j, params, block_n=256, matmul_dtype=jnp.float32))
    assert jnp.allclose(out_f32, ref, atol=1e-5, rtol=1e-5)

    # 3) General out_channels > 1 fallback path.
    params4 = init_params(kp, IN_CH, HID, 4)
    ref4 = link_predictor_ref(x_i, x_j, params4)
    out4 = jax.block_until_ready(
        link_predictor(x_i, x_j, params4, block_n=256, matmul_dtype=jnp.float32))
    assert out4.shape == (N, 4)
    assert jnp.allclose(out4, ref4, atol=1e-5, rtol=1e-5)

    print("KERNEL_OK")
</pallas_src>

<mosaic_0001>
module attributes {stable_mosaic.version = 11 : i64} {
  func.func @_linkpred_kernel_lane_dense(%arg0: i32, %arg1: memref<256x32xf32, #tpu.memory_space<vmem>>, %arg2: memref<256x32xf32, #tpu.memory_space<vmem>>, %arg3: memref<32x32xbf16, #tpu.memory_space<vmem>>, %arg4: memref<1x32xf32, #tpu.memory_space<vmem>>, %arg5: memref<32x32xbf16, #tpu.memory_space<vmem>>, %arg6: memref<1x32xf32, #tpu.memory_space<vmem>>, %arg7: memref<1x32xf32, #tpu.memory_space<vmem>>, %arg8: memref<1x1xf32, #tpu.memory_space<vmem>>, %arg9: memref<1x256xf32, #tpu.memory_space<vmem>>) attributes {dimension_semantics = [#tpu.dimension_semantics<parallel>], iteration_bounds = array<i64: 4>, scalar_prefetch = 0 : i64, scratch_operands = 0 : i64, tpu.core_type = #tpu.core_type<tc>, window_params = [{transform_indices = @transform_0, window_bounds = array<i64: 256, 32>}, {transform_indices = @transform_1, window_bounds = array<i64: 256, 32>}, {pipeline_mode = #tpu.pipeline_mode<synchronous>, transform_indices = @transform_2, window_bounds = array<i64: 32, 32>}, {pipeline_mode = #tpu.pipeline_mode<synchronous>, transform_indices = @transform_3, window_bounds = array<i64: 1, 32>}, {pipeline_mode = #tpu.pipeline_mode<synchronous>, transform_indices = @transform_4, window_bounds = array<i64: 32, 32>}, {pipeline_mode = #tpu.pipeline_mode<synchronous>, transform_indices = @transform_5, window_bounds = array<i64: 1, 32>}, {pipeline_mode = #tpu.pipeline_mode<synchronous>, transform_indices = @transform_6, window_bounds = array<i64: 1, 32>}, {pipeline_mode = #tpu.pipeline_mode<synchronous>, transform_indices = @transform_7, window_bounds = array<i64: 1, 1>}, {transform_indices = @transform_8, window_bounds = array<i64: 1, 256>}]} {
    %c0 = arith.constant 0 : index
    %c0_0 = arith.constant 0 : index
    %0 = vector.load %arg1[%c0, %c0_0] : memref<256x32xf32, #tpu.memory_space<vmem>>, vector<256x32xf32>
    %c0_1 = arith.constant 0 : index
    %c0_2 = arith.constant 0 : index
    %1 = vector.load %arg2[%c0_1, %c0_2] : memref<256x32xf32, #tpu.memory_space<vmem>>, vector<256x32xf32>
    %2 = arith.mulf %0, %1 : vector<256x32xf32>
    %3 = arith.truncf %2 : vector<256x32xf32> to vector<256x32xbf16>
    %c0_3 = arith.constant 0 : index
    %c0_4 = arith.constant 0 : index
    %4 = vector.load %arg3[%c0_3, %c0_4] : memref<32x32xbf16, #tpu.memory_space<vmem>>, vector<32x32xbf16>
    %cst = arith.constant dense<0.000000e+00> : vector<256x32xf32>
    %5 = tpu.matmul %3, %4, %cst {dimension_numbers = #tpu.dot_dimension_numbers<[1], [0], [0], [1], [0, 0, 1, 1], [], []>} : vector<256x32xbf16>, vector<32x32xbf16>, vector<256x32xf32> -> vector<256x32xf32>
    %c0_5 = arith.constant 0 : index
    %c0_6 = arith.constant 0 : index
    %6 = vector.load %arg4[%c0_5, %c0_6] : memref<1x32xf32, #tpu.memory_space<vmem>>, vector<1x32xf32>
    %7 = vector.broadcast %6 : vector<1x32xf32> to vector<256x32xf32>
    %8 = arith.addf %5, %7 : vector<256x32xf32>
    %cst_7 = arith.constant 0.000000e+00 : f32
    %9 = vector.broadcast %cst_7 : f32 to vector<256x32xf32>
    %10 = arith.maximumf %8, %9 : vector<256x32xf32>
    %11 = arith.truncf %10 : vector<256x32xf32> to vector<256x32xbf16>
    %c0_8 = arith.constant 0 : index
    %c0_9 = arith.constant 0 : index
    %12 = vector.load %arg5[%c0_8, %c0_9] : memref<32x32xbf16, #tpu.memory_space<vmem>>, vector<32x32xbf16>
    %cst_10 = arith.constant dense<0.000000e+00> : vector<256x32xf32>
    %13 = tpu.matmul %11, %12, %cst_10 {dimension_numbers = #tpu.dot_dimension_numbers<[1], [0], [0], [1], [0, 0, 1, 1], [], []>} : vector<256x32xbf16>, vector<32x32xbf16>, vector<256x32xf32> -> vector<256x32xf32>
    %c0_11 = arith.constant 0 : index
    %c0_12 = arith.constant 0 : index
    %14 = vector.load %arg6[%c0_11, %c0_12] : memref<1x32xf32, #tpu.memory_space<vmem>>, vector<1x32xf32>
    %15 = vector.broadcast %14 : vector<1x32xf32> to vector<256x32xf32>
    %16 = arith.addf %13, %15 : vector<256x32xf32>
    %cst_13 = arith.constant 0.000000e+00 : f32
    %17 = vector.broadcast %cst_13 : f32 to vector<256x32xf32>
    %18 = arith.maximumf %16, %17 : vector<256x32xf32>
    %c0_14 = arith.constant 0 : index
    %c0_15 = arith.constant 0 : index
    %19 = vector.load %arg7[%c0_14, %c0_15] : memref<1x32xf32, #tpu.memory_space<vmem>>, vector<1x32xf32>
    %20 = vector.broadcast %19 : vector<1x32xf32> to vector<256x32xf32>
    %21 = arith.mulf %18, %20 : vector<256x32xf32>
    %cst_16 = arith.constant dense<0.000000e+00> : vector<256xf32>
    %22 = vector.multi_reduction <add>, %21, %cst_16 [1] : vector<256x32xf32> to vector<256xf32>
    %23 = vector.shape_cast %22 : vector<256xf32> to vector<1x256xf32>
    %c0_17 = arith.constant 0 : index
    %c0_18 = arith.constant 0 : index
    %24 = vector.load %arg8[%c0_17, %c0_18] : memref<1x1xf32, #tpu.memory_space<vmem>>, vector<1x1xf32>
    %25 = vector.broadcast %24 : vector<1x1xf32> to vector<1x256xf32>
    %26 = arith.addf %23, %25 : vector<1x256xf32>
    %27 = arith.negf %26 : vector<1x256xf32>
    %28 = math.exp %27 : vector<1x256xf32>
    %cst_19 = arith.constant 1.000000e+00 : f32
    %29 = vector.broadcast %cst_19 : f32 to vector<1x256xf32>
    %30 = arith.addf %29, %28 : vector<1x256xf32>
    %31 = arith.divf %29, %30 : vector<1x256xf32>
    %c0_20 = arith.constant 0 : index
    %c0_21 = arith.constant 0 : index
    %32 = vector.load %arg9[%c0_20, %c0_21] : memref<1x256xf32, #tpu.memory_space<vmem>>, vector<1x256xf32>
    tpu.vector_store %arg9[%c0_20, %c0_21], %31 {strides = array<i32>} : memref<1x256xf32, #tpu.memory_space<vmem>>, vector<1x256xf32>,
    return
  }
  func.func @transform_0(%arg0: i32) -> (i32, i32) {
    %c0_i32 = arith.constant 0 : i32
    %c0_i32_0 = arith.constant 0 : i32
    return %arg0, %c0_i32 : i32, i32
  }
  func.func @transform_1(%arg0: i32) -> (i32, i32) {
    %c0_i32 = arith.constant 0 : i32
    %c0_i32_0 = arith.constant 0 : i32
    return %arg0, %c0_i32 : i32, i32
  }
  func.func @transform_2(%arg0: i32) -> (i32, i32) {
    %c0_i32 = arith.constant 0 : i32
    %c0_i32_0 = arith.constant 0 : i32
    %c0_i32_1 = arith.constant 0 : i32
    return %c0_i32, %c0_i32_0 : i32, i32
  }
  func.func @transform_3(%arg0: i32) -> (i32, i32) {
    %c0_i32 = arith.constant 0 : i32
    %c0_i32_0 = arith.constant 0 : i32
    %c0_i32_1 = arith.constant 0 : i32
    return %c0_i32, %c0_i32_0 : i32, i32
  }
  func.func @transform_4(%arg0: i32) -> (i32, i32) {
    %c0_i32 = arith.constant 0 : i32
    %c0_i32_0 = arith.constant 0 : i32
    %c0_i32_1 = arith.constant 0 : i32
    return %c0_i32, %c0_i32_0 : i32, i32
  }
  func.func @transform_5(%arg0: i32) -> (i32, i32) {
    %c0_i32 = arith.constant 0 : i32
    %c0_i32_0 = arith.constant 0 : i32
    %c0_i32_1 = arith.constant 0 : i32
    return %c0_i32, %c0_i32_0 : i32, i32
  }
  func.func @transform_6(%arg0: i32) -> (i32, i32) {
    %c0_i32 = arith.constant 0 : i32
    %c0_i32_0 = arith.constant 0 : i32
    %c0_i32_1 = arith.constant 0 : i32
    return %c0_i32, %c0_i32_0 : i32, i32
  }
  func.func @transform_7(%arg0: i32) -> (i32, i32) {
    %c0_i32 = arith.constant 0 : i32
    %c0_i32_0 = arith.constant 0 : i32
    %c0_i32_1 = arith.constant 0 : i32
    return %c0_i32, %c0_i32_0 : i32, i32
  }
  func.func @transform_8(%arg0: i32) -> (i32, i32) {
    %c0_i32 = arith.constant 0 : i32
    %c0_i32_0 = arith.constant 0 : i32
    return %c0_i32, %arg0 : i32, i32
  }
}

</mosaic_0001>

<bundles_post_ra>
// kernel: link_predictor.1
= control target key start
LH: loop header
LB: loop body
LE: loop exit
PB: predicated region body
PF: predicated region fallthrough
CT: control target
= control target key end

     0   :  { %s2762_s29 = smov 0   ;;  %s3583_s0 = inlined_call_operand.vmem [shape: f32[1024,32], index: 0, kind: input, shape index: {}]   ;;  %s3584_s1 = inlined_call_operand.vmem [shape: f32[1024,32], index: 1, kind: input, shape index: {}]   ;;  %s3585_s2 = inlined_call_operand.vmem [shape: bf16[32,32], index: 2, kind: input, shape index: {}]   ;;  %s3586_s3 = inlined_call_operand.vmem [shape: f32[1,32], index: 3, kind: input, shape index: {}]   ;;  %s3587_s4 = inlined_call_operand.vmem [shape: bf16[32,32], index: 4, kind: input, shape index: {}]   ;;  %s3588_s5 = inlined_call_operand.vmem [shape: f32[1,32], index: 5, kind: input, shape index: {}]   ;;  %s3589_s6 = inlined_call_operand.vmem [shape: f32[1,32], index: 6, kind: input, shape index: {}]   ;;  %s3590_s7 = inlined_call_operand.<no memory space> [shape: f32[1,1], index: 7, kind: input, shape index: {}]   ;;  %s3591_s8 = inlined_call_operand.vmem [shape: f32[1,1024], index: 8, kind: output, shape index: {}]  }
   0x1   :  { %v13_v0 = vstv %s3590_s7 }
   0x2   :  { %14 = vst [vmem:[#allocation2] sm:$0x1] %v13_v0 }
   0x3 LB: > { %s2462_s30 = sadd.s32 4294967295, %s2711_s29   ;;  %p2466_p0 = scmp.ge.s32.totalorder %s2711_s29, 1  ;;  %s2711_s29 = sphi %s2762_s29, %s20_s29  }
   0x4   : > { %p276_p1 = scmp.lt.s32.totalorder %s2711_s29, 5 }
   0x6   : > { %p277_p2 = pnand %p2466_p0, %p276_p1 }
   0x7   : > { %s2467_s7 = sshll.u32 (!%p277_p2), %s2462_s30, 5  ;;  %s2471_s10 = sshll.u32 (!%p277_p2), %s2462_s30, 1 }
   0x8   : > { %280 = sbr.rel (%p277_p2) target bundleno = 1045 (0x415), region = 52  ;;  %p315_p3 = scmp.lt.s32.totalorder (!%p277_p2), %s2467_s7, 127 }
   0x9   : > { %p327_p4 = scmp.lt.s32.totalorder (!%p277_p2), %s2471_s10, 7 }
   0xd   : > { %v2555_v1 = vld [vmem:[%s3585_s2 + $0x8] sm:$0xff]  ;;  %v2554_v2 = vld [vmem:[%s3585_s2] sm:$0xff]  ;;  %s3593_s7 = smov (!%p315_p3, %s2467_s7), 127  ;;  %vm464_vm0 = vcmask 261120   ;;  %s3595_s10 = smov (!%p327_p4, %s2471_s10), 7 }
   0xe   : > { %519 = vmatpush.bf16.msra.mxu0 %v2555_v1  ;;  %2558 = vmatpush.bf16.msra.mxu2 %v2555_v1  ;;  %s2468_s13 = sshll.u32 %s3593_s7, 3  ;;  %s329_s11 = scalar_lea.vmem %s3591_s8, %s3595_s10 }
   0xf   : > { %s2781_s16 = scalar_lea.vmem %s3583_s0, %s2468_s13  ;;  %s2786_s19 = scalar_lea.vmem %s3584_s1, %s2468_s13 }
  0x10   : > { %v332_v3 = vld [vmem:[%s2781_s16] sm:$0xff]  ;;  %v333_v4 = vld [vmem:[%s2781_s16 + $0x8] sm:$0xff]  ;;  %v334_v17 = vld [vmem:[%s2781_s16 + $0x10] sm:$0xff] }
  0x11   : > { %v364_v5 = vld [vmem:[%s2786_s19] sm:$0xff]  ;;  %v365_v6 = vld [vmem:[%s2786_s19 + $0x8] sm:$0xff]  ;;  %v335_v18 = vld [vmem:[%s2781_s16 + $0x18] sm:$0xff] }
  0x12   : > { %520 = vmatpush.bf16.msra.mxu0 %v2554_v2  ;;  %2559 = vmatpush.bf16.msra.mxu2 %v2554_v2  ;;  %v396_v7 = vmul.f32 %v364_v5, %v332_v3  ;;  %v397_v8 = vmul.f32 %v365_v6, %v333_v4  ;;  %v348_v9 = vld [vmem:[%s2781_s16 + $0x80] sm:$0xff]  ;;  %v349_v10 = vld [vmem:[%s2781_s16 + $0x88] sm:$0xff]  ;;  %v366_v19 = vld [vmem:[%s2786_s19 + $0x10] sm:$0xff] }
  0x13   : > { %v380_v11 = vld [vmem:[%s2786_s19 + $0x80] sm:$0xff]  ;;  %v381_v12 = vld [vmem:[%s2786_s19 + $0x88] sm:$0xff]  ;;  %v367_v20 = vld [vmem:[%s2786_s19 + $0x18] sm:$0xff]  ;;  %v398_v25 = vmul.f32 %v366_v19, %v334_v17 }
  0x14   : > { %v428_v13 = vpack.c.bf16 %v397_v8, %v396_v7  ;;  %v412_v14 = vmul.f32 %v380_v11, %v348_v9  ;;  %v413_v15 = vmul.f32 %v381_v12, %v349_v10  ;;  %v350_v21 = vld [vmem:[%s2781_s16 + $0x90] sm:$0xff]  ;;  %v351_v22 = vld [vmem:[%s2781_s16 + $0x98] sm:$0xff]  ;;  %v399_v26 = vmul.f32 %v367_v20, %v335_v18  ;;  %v336_v31 = vld [vmem:[%s2781_s16 + $0x20] sm:$0xff] }
  0x15   : > { %v382_v23 = vld [vmem:[%s2786_s19 + $0x90] sm:$0xff]  ;;  %v383_v24 = vld [vmem:[%s2786_s19 + $0x98] sm:$0xff]  ;;  %v337_v32 = vld [vmem:[%s2781_s16 + $0x28] sm:$0xff] }
  0x16   : > { %2480 = vmatmul.msk.bf16.vlgmr.msra.gmra.mxu0 %vm464_vm0, %v428_v13  ;;  %v436_v16 = vpack.c.bf16 %v413_v15, %v412_v14  ;;  %v414_v27 = vmul.f32 %v382_v23, %v350_v21  ;;  %v415_v28 = vmul.f32 %v383_v24, %v351_v22  ;;  %v429_v29 = vpack.c.bf16 %v399_v26, %v398_v25  ;;  %v368_v33 = vld [vmem:[%s2786_s19 + $0x20] sm:$0xff]  ;;  %v369_v34 = vld [vmem:[%s2786_s19 + $0x28] sm:$0xff]  ;;  %v338_v45 = vld [vmem:[%s2781_s16 + $0x30] sm:$0xff] }
  0x17   : > { %v352_v35 = vld [vmem:[%s2781_s16 + $0xa0] sm:$0xff]  ;;  %v353_v36 = vld [vmem:[%s2781_s16 + $0xa8] sm:$0xff]  ;;  %v400_v39 = vmul.f32 %v368_v33, %v336_v31  ;;  %v401_v40 = vmul.f32 %v369_v34, %v337_v32  ;;  %v339_v46 = vld [vmem:[%s2781_s16 + $0x38] sm:$0xff] }
  0x18   : > { %2488 = vmatmul.msk.bf16.vlgmr.msra.gmra.mxu2 %vm464_vm0, %v436_v16  ;;  %v437_v30 = vpack.c.bf16 %v415_v28, %v414_v27  ;;  %v384_v37 = vld [vmem:[%s2786_s19 + $0xa0] sm:$0xff]  ;;  %v385_v38 = vld [vmem:[%s2786_s19 + $0xa8] sm:$0xff]  ;;  %v370_v47 = vld [vmem:[%s2786_s19 + $0x30] sm:$0xff] }
  0x19   : > { %v416_v41 = vmul.f32 %v384_v37, %v352_v35  ;;  %v417_v42 = vmul.f32 %v385_v38, %v353_v36  ;;  %v430_v43 = vpack.c.bf16 %v401_v40, %v400_v39  ;;  %v371_v48 = vld [vmem:[%s2786_s19 + $0x38] sm:$0xff]  ;;  %v354_v49 = vld [vmem:[%s2781_s16 + $0xb0] sm:$0xff]  ;;  %v402_v53 = vmul.f32 %v370_v47, %v338_v45  ;;  %v340_v59 = vld [vmem:[%s2781_s16 + $0x40] sm:$0xff] }
  0x1a   : > { %v355_v50 = vld [vmem:[%s2781_s16 + $0xb8] sm:$0xff]  ;;  %v386_v51 = vld [vmem:[%s2786_s19 + $0xb0] sm:$0xff]  ;;  %v403_v54 = vmul.f32 %v371_v48, %v339_v46  ;;  %v341_v60 = vld [vmem:[%s2781_s16 + $0x48] sm:$0xff] }
  0x1b   : > { %v438_v44 = vpack.c.bf16 %v417_v42, %v416_v41  ;;  %v387_v52 = vld [vmem:[%s2786_s19 + $0xb8] sm:$0xff]  ;;  %v418_v55 = vmul.f32 %v386_v51, %v354_v49  ;;  %v372_v61 = vld [vmem:[%s2786_s19 + $0x40] sm:$0xff]  ;;  %v373_v62 = vld [vmem:[%s2786_s19 + $0x48] sm:$0xff] }
  0x1c   : > { %v419_v56 = vmul.f32 %v387_v52, %v355_v50  ;;  %v431_v57 = vpack.c.bf16 %v403_v54, %v402_v53  ;;  %v356_v63 = vld [vmem:[%s2781_s16 + $0xc0] sm:$0xff]  ;;  %v357_v0 = vld [vmem:[%s2781_s16 + $0xc8] sm:$0xff]  ;;  %v404_v3 = vmul.f32 %v372_v61, %v340_v59  ;;  %v405_v4 = vmul.f32 %v373_v62, %v341_v60  ;;  %v342_v9 = vld [vmem:[%s2781_s16 + $0x50] sm:$0xff] }
  0x1d   : > { %v388_v1 = vld [vmem:[%s2786_s19 + $0xc0] sm:$0xff]  ;;  %v389_v2 = vld [vmem:[%s2786_s19 + $0xc8] sm:$0xff]  ;;  %v343_v10 = vld [vmem:[%s2781_s16 + $0x58] sm:$0xff] }
  0x1e   : > { %v439_v58 = vpack.c.bf16 %v419_v56, %v418_v55  ;;  %v420_v5 = vmul.f32 %v388_v1, %v356_v63  ;;  %v421_v6 = vmul.f32 %v389_v2, %v357_v0  ;;  %v432_v7 = vpack.c.bf16 %v405_v4, %v404_v3  ;;  %v374_v11 = vld [vmem:[%s2786_s19 + $0x50] sm:$0xff]  ;;  %v375_v12 = vld [vmem:[%s2786_s19 + $0x58] sm:$0xff]  ;;  %v344_v23 = vld [vmem:[%s2781_s16 + $0x60] sm:$0xff] }
  0x1f   : > { %v358_v13 = vld [vmem:[%s2781_s16 + $0xd0] sm:$0xff]  ;;  %v359_v14 = vld [vmem:[%s2781_s16 + $0xd8] sm:$0xff]  ;;  %v406_v17 = vmul.f32 %v374_v11, %v342_v9  ;;  %v407_v18 = vmul.f32 %v375_v12, %v343_v10  ;;  %v345_v24 = vld [vmem:[%s2781_s16 + $0x68] sm:$0xff] }
  0x20   : > { %v440_v8 = vpack.c.bf16 %v421_v6, %v420_v5  ;;  %v390_v15 = vld [vmem:[%s2786_s19 + $0xd0] sm:$0xff]  ;;  %v391_v16 = vld [vmem:[%s2786_s19 + $0xd8] sm:$0xff]  ;;  %v376_v25 = vld [vmem:[%s2786_s19 + $0x60] sm:$0xff] }
  0x21   : > { %v422_v19 = vmul.f32 %v390_v15, %v358_v13  ;;  %v423_v20 = vmul.f32 %v391_v16, %v359_v14  ;;  %v433_v21 = vpack.c.bf16 %v407_v18, %v406_v17  ;;  %v377_v26 = vld [vmem:[%s2786_s19 + $0x68] sm:$0xff]  ;;  %v360_v27 = vld [vmem:[%s2781_s16 + $0xe0] sm:$0xff]  ;;  %v408_v31 = vmul.f32 %v376_v25, %v344_v23  ;;  %v346_v38 = vld [vmem:[%s2781_s16 + $0x70] sm:$0xff] }
  0x22   : > { %v361_v28 = vld [vmem:[%s2781_s16 + $0xe8] sm:$0xff]  ;;  %v409_v32 = vmul.f32 %v377_v26, %v345_v24  ;;  %v347_v39 = vld [vmem:[%s2781_s16 + $0x78] sm:$0xff]  ;;  %v378_v40 = vld [vmem:[%s2786_s19 + $0x70] sm:$0xff] }
  0x23   : > { %v441_v22 = vpack.c.bf16 %v423_v20, %v422_v19  ;;  %v2557_v37 = vld [vmem:[%s3587_s4 + $0x8] sm:$0xff]  ;;  %v379_v41 = vld [vmem:[%s2786_s19 + $0x78] sm:$0xff]  ;;  %v362_v42 = vld [vmem:[%s2781_s16 + $0xf0] sm:$0xff]  ;;  %v410_v47 = vmul.f32 %v378_v40, %v346_v38 }
  0x24   : > { %v434_v35 = vpack.c.bf16 %v409_v32, %v408_v31  ;;  %724 = vmatpush.bf16.msra.mxu1 %v2557_v37  ;;  %2560 = vmatpush.bf16.msra.mxu3 %v2557_v37  ;;  %v395_v45 = vld [vmem:[%s2786_s19 + $0xf8] sm:$0xff]  ;;  %v2556_v46 = vld [vmem:[%s3587_s4] sm:$0xff]  ;;  %v411_v48 = vmul.f32 %v379_v41, %v347_v39 }
  0x25   : > { %v2877_v54 = vld [vmem:[%s3586_s3] ss:$0 sm:$0xff] }
  0x26   : > { %2481 = vmatmul.msk.bf16.gmra.mxu0 %vm464_vm0, %v429_v29  ;;  %v392_v29 = vld [vmem:[%s2786_s19 + $0xe0] sm:$0xff]  ;;  %v435_v51 = vpack.c.bf16 %v411_v48, %v410_v47 }
  0x27   : > { %v424_v33 = vmul.f32 %v392_v29, %v360_v27 }
  0x28   : > { %2489 = vmatmul.msk.bf16.gmra.mxu2 %vm464_vm0, %v437_v30  ;;  %v393_v30 = vld [vmem:[%s2786_s19 + $0xe8] sm:$0xff]  ;;  %725 = vmatpush.bf16.msra.mxu1 %v2556_v46 }
  0x29   : > { %v425_v34 = vmul.f32 %v393_v30, %v361_v28  ;;  %2561 = vmatpush.bf16.msra.mxu3 %v2556_v46 }
  0x2b   : > { %v442_v36 = vpack.c.bf16 %v425_v34, %v424_v33 }
  0x36   : > { %2482 = vmatmul.msk.bf16.gmra.mxu0 %vm464_vm0, %v430_v43  ;;  %v363_v43 = vld [vmem:[%s2781_s16 + $0xf8] sm:$0xff] }
  0x37   : > { %v427_v50 = vmul.f32 %v395_v45, %v363_v43 }
  0x38   : > { %2490 = vmatmul.msk.bf16.gmra.mxu2 %vm464_vm0, %v438_v44  ;;  %v394_v44 = vld [vmem:[%s2786_s19 + $0xf0] sm:$0xff] }
  0x39   : > { %v426_v49 = vmul.f32 %v394_v44, %v362_v42 }
  0x3b   : > { %v443_v52 = vpack.c.bf16 %v427_v50, %v426_v49 }
  0x46   : > { %2483 = vmatmul.msk.bf16.gmra.mxu0 %vm464_vm0, %v431_v57 }
  0x48   : > { %2491 = vmatmul.msk.bf16.gmra.mxu2 %vm464_vm0, %v439_v58 }
  0x56   : > { %2484 = vmatmul.msk.bf16.gmra.mxu0 %vm464_vm0, %v432_v7 }
  0x58   : > { %2492 = vmatmul.msk.bf16.gmra.mxu2 %vm464_vm0, %v440_v8 }
  0x66   : > { %2485 = vmatmul.msk.bf16.gmra.mxu0 %vm464_vm0, %v433_v21 }
  0x68   : > { %2493 = vmatmul.msk.bf16.gmra.mxu2 %vm464_vm0, %v441_v22 }
  0x76   : > { %2486 = vmatmul.msk.bf16.gmra.mxu0 %vm464_vm0, %v434_v35 }
  0x78   : > { %2494 = vmatmul.msk.bf16.gmra.mxu2 %vm464_vm0, %v442_v36 }
  0x86   : > { %2487 = vmatmul.msk.bf16.gmra.mxu0 %vm464_vm0, %v435_v51  ;;  %v2713_v51 = vmov 0  }
  0x87   : > { %2571 = vset.pattern.permute.xlu0 %v2713_v51  ;;  %2572 = vset.pattern.permute.xlu2 %v2713_v51 }
  0x88   : > { %2495 = vmatmul.msk.bf16.gmra.mxu2 %vm464_vm0, %v443_v52  ;;  %v971_v52 = vld [vmem:[#allocation2] sm:$0x1]  ;;  %2573 = vset.pattern.permute.xlu1 %v2713_v51 }
  0x89   : > { %974 = vperm.xlu0 %2571, %v971_v52  }
  0x93   : > { %v522_v53 = vpop.f32.mrf.mxu0 }
  0x94   : > { %v523_v55 = vadd.f32 %v2877_v54, %v522_v53 }
  0x96   : > { %v602_v59 = vmax.f32 %v523_v55, 0.0 }
  0x9b   : > { %v524_v56 = vpop.f32.mrf.mxu0  ;;  %v562_v57 = vpop.f32.mrf.mxu2 }
  0x9c   : > { %v525_v58 = vadd.f32 %v2877_v54, %v524_v56  ;;  %v563_v62 = vadd.f32 %v2877_v54, %v562_v57 }
  0x9e   : > { %v603_v60 = vmax.f32 %v525_v58, 0.0  ;;  %v618_v1 = vmax.f32 %v563_v62, 0.0 }
  0xa0   : > { %v634_v61 = vpack.c.bf16 %v603_v60, %v602_v59 }
  0xa2   : > { %2504 = vmatmul.msk.bf16.vlgmr.msra.gmra.mxu1 %vm464_vm0, %v634_v61 }
  0xa3   : > { %v527_v63 = vpop.f32.mrf.mxu0  ;;  %v564_v0 = vpop.f32.mrf.mxu2 }
  0xa4   : > { %v565_v2 = vadd.f32 %v2877_v54, %v564_v0  ;;  %v528_v5 = vadd.f32 %v2877_v54, %v527_v63 }
  0xa6   : > { %v619_v3 = vmax.f32 %v565_v2, 0.0  ;;  %v604_v9 = vmax.f32 %v528_v5, 0.0 }
  0xa8   : > { %v642_v4 = vpack.c.bf16 %v619_v3, %v618_v1 }
  0xaa   : > { %2512 = vmatmul.msk.bf16.vlgmr.msra.gmra.mxu3 %vm464_vm0, %v642_v4 }
  0xab   : > { %v529_v6 = vpop.f32.mrf.mxu0  ;;  %v567_v7 = vpop.f32.mrf.mxu2 }
  0xac   : > { %v530_v8 = vadd.f32 %v2877_v54, %v529_v6  ;;  %v568_v12 = vadd.f32 %v2877_v54, %v567_v7 }
  0xae   : > { %v605_v10 = vmax.f32 %v530_v8, 0.0  ;;  %v620_v15 = vmax.f32 %v568_v12, 0.0 }
  0xb0   : > { %v635_v11 = vpack.c.bf16 %v605_v10, %v604_v9 }
  0xb2   : > { %2505 = vmatmul.msk.bf16.gmra.mxu1 %vm464_vm0, %v635_v11 }
  0xb3   : > { %v532_v13 = vpop.f32.mrf.mxu0  ;;  %v569_v14 = vpop.f32.mrf.mxu2 }
  0xb4   : > { %v570_v16 = vadd.f32 %v2877_v54, %v569_v14  ;;  %v533_v19 = vadd.f32 %v2877_v54, %v532_v13 }
  0xb6   : > { %v621_v17 = vmax.f32 %v570_v16, 0.0  ;;  %v606_v23 = vmax.f32 %v533_v19, 0.0 }
  0xb8   : > { %v643_v18 = vpack.c.bf16 %v621_v17, %v620_v15 }
  0xba   : > { %2513 = vmatmul.msk.bf16.gmra.mxu3 %vm464_vm0, %v643_v18 }
  0xbb   : > { %v534_v20 = vpop.f32.mrf.mxu0  ;;  %v572_v21 = vpop.f32.mrf.mxu2 }
  0xbc   : > { %v535_v22 = vadd.f32 %v2877_v54, %v534_v20  ;;  %v573_v26 = vadd.f32 %v2877_v54, %v572_v21 }
  0xbe   : > { %v607_v24 = vmax.f32 %v535_v22, 0.0  ;;  %v622_v29 = vmax.f32 %v573_v26, 0.0 }
  0xc0   : > { %v636_v25 = vpack.c.bf16 %v607_v24, %v606_v23 }
  0xc2   : > { %2506 = vmatmul.msk.bf16.gmra.mxu1 %vm464_vm0, %v636_v25 }
  0xc3   : > { %v537_v27 = vpop.f32.mrf.mxu0  ;;  %v574_v28 = vpop.f32.mrf.mxu2 }
  0xc4   : > { %v575_v30 = vadd.f32 %v2877_v54, %v574_v28  ;;  %v538_v33 = vadd.f32 %v2877_v54, %v537_v27 }
  0xc6   : > { %v623_v31 = vmax.f32 %v575_v30, 0.0  ;;  %v608_v37 = vmax.f32 %v538_v33, 0.0 }
  0xc8   : > { %v644_v32 = vpack.c.bf16 %v623_v31, %v622_v29 }
  0xca   : > { %2514 = vmatmul.msk.bf16.gmra.mxu3 %vm464_vm0, %v644_v32 }
  0xcb   : > { %v539_v34 = vpop.f32.mrf.mxu0  ;;  %v577_v35 = vpop.f32.mrf.mxu2 }
  0xcc   : > { %v540_v36 = vadd.f32 %v2877_v54, %v539_v34  ;;  %v578_v40 = vadd.f32 %v2877_v54, %v577_v35 }
  0xce   : > { %v609_v38 = vmax.f32 %v540_v36, 0.0  ;;  %v624_v43 = vmax.f32 %v578_v40, 0.0 }
  0xd0   : > { %v637_v39 = vpack.c.bf16 %v609_v38, %v608_v37 }
  0xd2   : > { %2507 = vmatmul.msk.bf16.gmra.mxu1 %vm464_vm0, %v637_v39 }
  0xd3   : > { %v542_v41 = vpop.f32.mrf.mxu0  ;;  %v579_v42 = vpop.f32.mrf.mxu2 }
  0xd4   : > { %v580_v44 = vadd.f32 %v2877_v54, %v579_v42  ;;  %v543_v47 = vadd.f32 %v2877_v54, %v542_v41  ;;  %v2930_v41 = vld [vmem:[%s3588_s5] ss:$0 sm:$0xff] }
  0xd6   : > { %v625_v45 = vmax.f32 %v580_v44, 0.0  ;;  %v610_v53 = vmax.f32 %v543_v47, 0.0  ;;  %v2936_v44 = vld [vmem:[%s3589_s6] ss:$0 sm:$0xff] }
  0xd8   : > { %v645_v46 = vpack.c.bf16 %v625_v45, %v624_v43 }
  0xda   : > { %2515 = vmatmul.msk.bf16.gmra.mxu3 %vm464_vm0, %v645_v46 }
  0xdb   : > { %v544_v48 = vpop.f32.mrf.mxu0  ;;  %v582_v49 = vpop.f32.mrf.mxu2 }
  0xdc   : > { %v545_v50 = vadd.f32 %v2877_v54, %v544_v48  ;;  %v583_v57 = vadd.f32 %v2877_v54, %v582_v49 }
  0xde   : > { %v611_v55 = vmax.f32 %v545_v50, 0.0  ;;  %v626_v60 = vmax.f32 %v583_v57, 0.0 }
  0xe0   : > { %v638_v56 = vpack.c.bf16 %v611_v55, %v610_v53 }
  0xe2   : > { %2508 = vmatmul.msk.bf16.gmra.mxu1 %vm464_vm0, %v638_v56 }
  0xe3   : > { %v547_v58 = vpop.f32.mrf.mxu0  ;;  %v584_v59 = vpop.f32.mrf.mxu2 }
  0xe4   : > { %v585_v61 = vadd.f32 %v2877_v54, %v584_v59  ;;  %v548_v0 = vadd.f32 %v2877_v54, %v547_v58 }
  0xe6   : > { %v627_v62 = vmax.f32 %v585_v61, 0.0  ;;  %v612_v4 = vmax.f32 %v548_v0, 0.0 }
  0xe8   : > { %v646_v63 = vpack.c.bf16 %v627_v62, %v626_v60 }
  0xea   : > { %2516 = vmatmul.msk.bf16.gmra.mxu3 %vm464_vm0, %v646_v63 }
  0xeb   : > { %v549_v1 = vpop.f32.mrf.mxu0  ;;  %v587_v2 = vpop.f32.mrf.mxu2 }
  0xec   : > { %v550_v3 = vadd.f32 %v2877_v54, %v549_v1  ;;  %v588_v7 = vadd.f32 %v2877_v54, %v587_v2 }
  0xee   : > { %v613_v5 = vmax.f32 %v550_v3, 0.0  ;;  %v628_v10 = vmax.f32 %v588_v7, 0.0 }
  0xf0   : > { %v639_v6 = vpack.c.bf16 %v613_v5, %v612_v4 }
  0xf2   : > { %2509 = vmatmul.msk.bf16.gmra.mxu1 %vm464_vm0, %v639_v6 }
  0xf3   : > { %v552_v8 = vpop.f32.mrf.mxu0  ;;  %v589_v9 = vpop.f32.mrf.mxu2 }
  0xf4   : > { %v590_v11 = vadd.f32 %v2877_v54, %v589_v9  ;;  %v553_v14 = vadd.f32 %v2877_v54, %v552_v8 }
  0xf6   : > { %v629_v12 = vmax.f32 %v590_v11, 0.0  ;;  %v614_v18 = vmax.f32 %v553_v14, 0.0 }
  0xf8   : > { %v647_v13 = vpack.c.bf16 %v629_v12, %v628_v10 }
  0xfa   : > { %2517 = vmatmul.msk.bf16.gmra.mxu3 %vm464_vm0, %v647_v13 }
  0xfb   : > { %v554_v15 = vpop.f32.mrf.mxu0  ;;  %v592_v16 = vpop.f32.mrf.mxu2 }
  0xfc   : > { %v555_v17 = vadd.f32 %v2877_v54, %v554_v15  ;;  %v593_v21 = vadd.f32 %v2877_v54, %v592_v16 }
  0xfe   : > { %v615_v19 = vmax.f32 %v555_v17, 0.0  ;;  %v630_v24 = vmax.f32 %v593_v21, 0.0 }
 0x100   : > { %v640_v20 = vpack.c.bf16 %v615_v19, %v614_v18 }
 0x102   : > { %2510 = vmatmul.msk.bf16.gmra.mxu1 %vm464_vm0, %v640_v20 }
 0x103   : > { %v557_v22 = vpop.f32.mrf.mxu0  ;;  %v594_v23 = vpop.f32.mrf.mxu2 }
 0x104   : > { %v595_v25 = vadd.f32 %v2877_v54, %v594_v23  ;;  %v558_v28 = vadd.f32 %v2877_v54, %v557_v22 }
 0x106   : > { %v631_v26 = vmax.f32 %v595_v25, 0.0  ;;  %v616_v32 = vmax.f32 %v558_v28, 0.0 }
 0x108   : > { %v648_v27 = vpack.c.bf16 %v631_v26, %v630_v24 }
 0x10a   : > { %2518 = vmatmul.msk.bf16.gmra.mxu3 %vm464_vm0, %v648_v27 }
 0x10b   : > { %v559_v29 = vpop.f32.mrf.mxu0  ;;  %v597_v30 = vpop.f32.mrf.mxu2 }
 0x10c   : > { %v560_v31 = vadd.f32 %v2877_v54, %v559_v29  ;;  %v598_v35 = vadd.f32 %v2877_v54, %v597_v30 }
 0x10e   : > { %v617_v33 = vmax.f32 %v560_v31, 0.0  ;;  %v632_v37 = vmax.f32 %v598_v35, 0.0 }
 0x110   : > { %v641_v34 = vpack.c.bf16 %v617_v33, %v616_v32 }
 0x112   : > { %2511 = vmatmul.msk.bf16.gmra.mxu1 %vm464_vm0, %v641_v34 }
 0x113   : > { %v599_v36 = vpop.f32.mrf.mxu2 }
 0x114   : > { %v600_v38 = vadd.f32 %v2877_v54, %v599_v36 }
 0x116   : > { %v633_v39 = vmax.f32 %v600_v38, 0.0 }
 0x118   : > { %v649_v40 = vpack.c.bf16 %v633_v39, %v632_v37 }
 0x11a   : > { %2519 = vmatmul.msk.bf16.gmra.mxu3 %vm464_vm0, %v649_v40 }
 0x11f   : > { %v727_v42 = vpop.f32.mrf.mxu1 }
 0x120   : > { %v728_v43 = vadd.f32 %v2930_v41, %v727_v42 }
 0x122   : > { %v807_v45 = vmax.f32 %v728_v43, 0.0 }
 0x124   : > { %v843_v54 = vmul.f32 %v2936_v44, %v807_v45 }
 0x126   : > { %v875_v46 = vsel %vm464_vm0, %v843_v54, 0.0 }
 0x127   : > { %v729_v47 = vpop.f32.mrf.mxu1  ;;  %876 = vadd.xlane.f32.xlu0 %v875_v46 }
 0x128   : > { %v730_v48 = vadd.f32 %v2930_v41, %v729_v47 }
 0x12a   : > { %v808_v49 = vmax.f32 %v730_v48, 0.0 }
 0x12c   : > { %v844_v50 = vmul.f32 %v2936_v44, %v808_v49 }
 0x12d   : > { %v2942_v51 = vpop.f32.mrf.mxu3 }
 0x12e   : > { %v878_v52 = vsel %vm464_vm0, %v844_v50, 0.0 }
 0x12f   : > { %v732_v53 = vpop.f32.mrf.mxu1  ;;  %879 = vadd.xlane.f32.xlu1 %v878_v52 }
 0x130   : > { %v733_v55 = vadd.f32 %v2930_v41, %v732_v53 }
 0x132   : > { %v809_v56 = vmax.f32 %v733_v55, 0.0 }
 0x134   : > { %v845_v57 = vmul.f32 %v2936_v44, %v809_v56 }
 0x135   : > { %v2947_v58 = vpop.f32.mrf.mxu3 }
 0x136   : > { %v881_v59 = vsel %vm464_vm0, %v845_v57, 0.0 }
 0x137   : > { %v734_v60 = vpop.f32.mrf.mxu1  ;;  %882 = vadd.xlane.f32.xlu1 %v881_v59 }
 0x138   : > { %v735_v61 = vadd.f32 %v2930_v41, %v734_v60  ;;  %v768_v60 = vadd.f32 %v2930_v41, %v2942_v51 }
 0x13a   : > { %v810_v62 = vmax.f32 %v735_v61, 0.0 }
 0x13c   : > { %v846_v63 = vmul.f32 %v2936_v44, %v810_v62 }
 0x13d   : > { %v2952_v0 = vpop.f32.mrf.mxu3 }
 0x13e   : > { %v884_v1 = vsel %vm464_vm0, %v846_v63, 0.0  ;;  %v823_v63 = vmax.f32 %v768_v60, 0.0 }
 0x13f   : > { %v737_v2 = vpop.f32.mrf.mxu1  ;;  %885 = vadd.xlane.f32.xlu2 %v884_v1 }
 0x140   : > { %v738_v3 = vadd.f32 %v2930_v41, %v737_v2 }
 0x142   : > { %v811_v4 = vmax.f32 %v738_v3, 0.0 }
 0x144   : > { %v847_v5 = vmul.f32 %v2936_v44, %v811_v4 }
 0x145   : > { %v2957_v6 = vpop.f32.mrf.mxu3 }
 0x146   : > { %v887_v7 = vsel %vm464_vm0, %v847_v5, 0.0  ;;  %v770_v5 = vadd.f32 %v2930_v41, %v2947_v58 }
 0x147   : > { %v739_v8 = vpop.f32.mrf.mxu1  ;;  %888 = vadd.xlane.f32.xlu2 %v887_v7  ;;  %v775_v7 = vadd.f32 %v2930_v41, %v2957_v6 }
 0x148   : > { %v740_v9 = vadd.f32 %v2930_v41, %v739_v8  ;;  %v859_v8 = vmul.f32 %v2936_v44, %v823_v63 }
 0x14a   : > { %v812_v10 = vmax.f32 %v740_v9, 0.0  ;;  %v975_v9 = vpop.permute.xlu0 %974 }
 0x14c   : > { %v848_v11 = vmul.f32 %v2936_v44, %v812_v10 }
 0x14d   : > { %v2962_v12 = vpop.f32.mrf.mxu3 }
 0x14e   : > { %v890_v13 = vsel %vm464_vm0, %v848_v11, 0.0  ;;  %v824_v11 = vmax.f32 %v770_v5, 0.0  ;;  %v778_v58 = vadd.f32 %v2930_v41, %v2962_v12 }
 0x14f   : > { %v742_v14 = vpop.f32.mrf.mxu1  ;;  %891 = vadd.xlane.f32.xlu1 %v890_v13  ;;  %v826_v13 = vmax.f32 %v775_v7, 0.0 }
 0x150   : > { %v743_v15 = vadd.f32 %v2930_v41, %v742_v14 }
 0x152   : > { %v813_v16 = vmax.f32 %v743_v15, 0.0  ;;  %v923_v15 = vsel %vm464_vm0, %v859_v8, 0.0 }
 0x154   : > { %v849_v17 = vmul.f32 %v2936_v44, %v813_v16 }
 0x155   : > { %v2967_v18 = vpop.f32.mrf.mxu3 }
 0x156   : > { %v893_v19 = vsel %vm464_vm0, %v849_v17, 0.0 }
 0x157   : > { %v744_v20 = vpop.f32.mrf.mxu1  ;;  %894 = vadd.xlane.f32.xlu2 %v893_v19 }
 0x158   : > { %v745_v21 = vadd.f32 %v2930_v41, %v744_v20 }
 0x15a   : > { %v814_v22 = vmax.f32 %v745_v21, 0.0  ;;  %v860_v21 = vmul.f32 %v2936_v44, %v824_v11 }
 0x15c   : > { %v850_v23 = vmul.f32 %v2936_v44, %v814_v22  ;;  %v862_v22 = vmul.f32 %v2936_v44, %v826_v13 }
 0x15d   : > { %v2972_v24 = vpop.f32.mrf.mxu3 }
 0x15e   : > { %v896_v25 = vsel %vm464_vm0, %v850_v23, 0.0  ;;  %v783_v19 = vadd.f32 %v2930_v41, %v2972_v24  ;;  %v773_v23 = vadd.f32 %v2930_v41, %v2952_v0  ;;  %v932_v24 = vsel %vm464_vm0, %v862_v22, 0.0 }
 0x15f   : > { %v747_v26 = vpop.f32.mrf.mxu1  ;;  %897 = vadd.xlane.f32.xlu1 %v896_v25  ;;  %v3021_v25 = vperm.slane %v975_v9, 0 }
 0x160   : > { %v748_v27 = vadd.f32 %v2930_v41, %v747_v26 }
 0x162   : > { %v815_v28 = vmax.f32 %v748_v27, 0.0  ;;  %v827_v27 = vmax.f32 %v778_v58, 0.0 }
 0x164   : > { %v851_v29 = vmul.f32 %v2936_v44, %v815_v28 }
 0x165   : > { %v2977_v30 = vpop.f32.mrf.mxu3 }
 0x166   : > { %v899_v31 = vsel %vm464_vm0, %v851_v29, 0.0  ;;  %v829_v29 = vmax.f32 %v783_v19, 0.0  ;;  %v785_v0 = vadd.f32 %v2930_v41, %v2977_v30 }
 0x167   : > { %v749_v32 = vpop.f32.mrf.mxu1  ;;  %900 = vadd.xlane.f32.xlu2 %v899_v31  ;;  %v926_v31 = vsel %vm464_vm0, %v860_v21, 0.0 }
 0x168   : > { %v750_v33 = vadd.f32 %v2930_v41, %v749_v32 }
 0x16a   : > { %v816_v34 = vmax.f32 %v750_v33, 0.0  ;;  %v825_v33 = vmax.f32 %v773_v23, 0.0 }
 0x16c   : > { %v852_v35 = vmul.f32 %v2936_v44, %v816_v34 }
 0x16d   : > { %v2983_v38 = vpop.f32.mrf.mxu3 }
 0x16e   : > { %v902_v36 = vsel %vm464_vm0, %v852_v35, 0.0 }
 0x16f   : > { %v752_v37 = vpop.f32.mrf.mxu1  ;;  %903 = vadd.xlane.f32.xlu1 %v902_v36 }
 0x170   : > { %v753_v39 = vadd.f32 %v2930_v41, %v752_v37  ;;  %v863_v37 = vmul.f32 %v2936_v44, %v827_v27 }
 0x172   : > { %v817_v40 = vmax.f32 %v753_v39, 0.0  ;;  %v865_v39 = vmul.f32 %v2936_v44, %v829_v29  ;;  %v935_v30 = vsel %vm464_vm0, %v863_v37, 0.0 }
 0x174   : > { %v853_v42 = vmul.f32 %v2936_v44, %v817_v40  ;;  %v780_v40 = vadd.f32 %v2930_v41, %v2967_v18  ;;  %v788_v18 = vadd.f32 %v2930_v41, %v2983_v38 }
 0x175   : > { %v789_v46 = vpop.f32.mrf.mxu3 }
 0x176   : > { %v905_v43 = vsel %vm464_vm0, %v853_v42, 0.0  ;;  %v790_v36 = vadd.f32 %v2930_v41, %v789_v46  ;;  %v941_v46 = vsel %vm464_vm0, %v865_v39, 0.0 }
 0x177   : > { %v754_v45 = vpop.f32.mrf.mxu1  ;;  %906 = vadd.xlane.f32.xlu2 %v905_v43  ;;  %v861_v43 = vmul.f32 %v2936_v44, %v825_v33 }
 0x178   : > { %v755_v54 = vadd.f32 %v2930_v41, %v754_v45 }
 0x17a   : > { %v818_v47 = vmax.f32 %v755_v54, 0.0 }
 0x17c   : > { %v854_v48 = vmul.f32 %v2936_v44, %v818_v47  ;;  %v830_v47 = vmax.f32 %v785_v0, 0.0 }
 0x17d   : > { %v2992_v55 = vpop.f32.mrf.mxu3 }
 0x17e   : > { %v908_v49 = vsel %vm464_vm0, %v854_v48, 0.0  ;;  %v832_v48 = vmax.f32 %v790_v36, 0.0  ;;  %v793_v60 = vadd.f32 %v2930_v41, %v2992_v55 }
 0x17f   : > { %v757_v50 = vpop.f32.mrf.mxu1  ;;  %909 = vadd.xlane.f32.xlu1 %v908_v49 }
 0x180   : > { %v758_v52 = vadd.f32 %v2930_v41, %v757_v50  ;;  %v828_v50 = vmax.f32 %v780_v40, 0.0 }
 0x182   : > { %v819_v53 = vmax.f32 %v758_v52, 0.0 }
 0x184   : > { %v855_v56 = vmul.f32 %v2936_v44, %v819_v53  ;;  %v929_v53 = vsel %vm464_vm0, %v861_v43, 0.0 }
 0x185   : > { %v3000_v2 = vpop.f32.mrf.mxu3 }
 0x186   : > { %v911_v57 = vsel %vm464_vm0, %v855_v56, 0.0  ;;  %v795_v0 = vadd.f32 %v2930_v41, %v3000_v2 }
 0x187   : > { %v759_v59 = vpop.f32.mrf.mxu1  ;;  %912 = vadd.xlane.f32.xlu2 %v911_v57  ;;  %v866_v57 = vmul.f32 %v2936_v44, %v830_v47 }
 0x188   : > { %v760_v61 = vadd.f32 %v2930_v41, %v759_v59  ;;  %v868_v59 = vmul.f32 %v2936_v44, %v832_v48  ;;  %v834_v48 = vmax.f32 %v795_v0, 0.0 }
 0x189   : > { %v944_v38 = vsel %vm464_vm0, %v866_v57, 0.0 }
 0x18a   : > { %v820_v62 = vmax.f32 %v760_v61, 0.0  ;;  %v950_v5 = vsel %vm464_vm0, %v868_v59, 0.0 }
 0x18c   : > { %v856_v1 = vmul.f32 %v2936_v44, %v820_v62  ;;  %v864_v62 = vmul.f32 %v2936_v44, %v828_v50 }
 0x18d   : > { %v797_v6 = vpop.f32.mrf.mxu3 }
 0x18e   : > { %v914_v3 = vsel %vm464_vm0, %v856_v1, 0.0  ;;  %v798_v61 = vadd.f32 %v2930_v41, %v797_v6  ;;  %v938_v55 = vsel %vm464_vm0, %v864_v62, 0.0 }
 0x18f   : > { %v762_v4 = vpop.f32.mrf.mxu1  ;;  %915 = vadd.xlane.f32.xlu1 %v914_v3 }
 0x190   : > { %v763_v51 = vadd.f32 %v2930_v41, %v762_v4  ;;  %v831_v4 = vmax.f32 %v788_v18, 0.0  ;;  %v835_v8 = vmax.f32 %v798_v61, 0.0 }
 0x192   : > { %v821_v10 = vmax.f32 %v763_v51, 0.0  ;;  %v833_v51 = vmax.f32 %v793_v60, 0.0  ;;  %v867_v58 = vmul.f32 %v2936_v44, %v831_v4 }
 0x194   : > { %v857_v14 = vmul.f32 %v2936_v44, %v821_v10 }
 0x195   : > { %v3035_v42 = vpop.f32.mrf.mxu3 }
 0x196   : > { %v917_v16 = vsel %vm464_vm0, %v857_v14, 0.0 }
 0x197   : > { %v764_v17 = vpop.f32.mrf.mxu1  ;;  %918 = vadd.xlane.f32.xlu2 %v917_v16  ;;  %924 = vadd.xlane.f32.xlu1 %v923_v15  ;;  %v869_v15 = vmul.f32 %v2936_v44, %v833_v51  ;;  %v871_v16 = vmul.f32 %v2936_v44, %v835_v8 }
 0x198   : > { %v765_v20 = vadd.f32 %v2930_v41, %v764_v17 }
 0x199   : > { %v953_v22 = vsel %vm464_vm0, %v869_v15, 0.0  ;;  %v959_v23 = vsel %vm464_vm0, %v871_v16, 0.0 }
 0x19a   : > { %v822_v26 = vmax.f32 %v765_v20, 0.0  ;;  %v877_v12 = vpop.xlane.xlu0 %876 }
 0x19b   : > { %v978_v28 = vadd.f32 %v3021_v25, %v877_v12 }
 0x19c   : > { %v858_v32 = vmul.f32 %v2936_v44, %v822_v26 }
 0x19d   : > { %v2520_v34 = vmul.f32 -1.442695, %v978_v28  ;;  %v3051_v3 = vpop.f32.mrf.mxu3  ;;  %v947_v28 = vsel %vm464_vm0, %v867_v58, 0.0 }
 0x19e   : > { %v920_v35 = vsel %vm464_vm0, %v858_v32, 0.0 }
 0x19f   : > { %2577 = vpow2.f32 %v2520_v34  ;;  %927 = vadd.xlane.f32.xlu2 %v926_v31  ;;  %933 = vadd.xlane.f32.xlu1 %v932_v24  ;;  %v800_v24 = vadd.f32 %v2930_v41, %v3035_v42 }
 0x1a0   : > { %921 = vadd.xlane.f32.xlu0 %v920_v35 }
 0x1a1   : > { %v836_v47 = vmax.f32 %v800_v24, 0.0 }
 0x1a2   : > { %v880_v45 = vpop.xlane.xlu1 %879 }
 0x1a3   : > { %v979_v54 = vadd.f32 %v3021_v25, %v880_v45  ;;  %v872_v61 = vmul.f32 %v2936_v44, %v836_v47 }
 0x1a5   : > { %v2578_v49 = vpop.eup %2577  ;;  %v2521_v52 = vmul.f32 -1.442695, %v979_v54  ;;  %v804_v27 = vpop.f32.mrf.mxu3 }
 0x1a6   : > { %v1106_v56 = vadd.f32 1.0, %v2578_v49  ;;  %v805_v37 = vadd.f32 %v2930_v41, %v804_v27 }
 0x1a7   : > { %2579 = vpow2.f32 %v2521_v52  ;;  %936 = vadd.xlane.f32.xlu2 %v935_v30  ;;  %942 = vadd.xlane.f32.xlu1 %v941_v46 }
 0x1a8   : > { %2581 = vrcp.f32 %v1106_v56  ;;  %930 = vadd.xlane.f32.xlu0 %v929_v53  ;;  %v1149_v17 = vand.u32 2147483648, %v1106_v56  ;;  %v1147_v20 = vand.u32 2147483647, %v1106_v56  ;;  %vm1143_vm2 = vweird.f32 %v1106_v56 }
 0x1a9   : > { %v838_v46 = vmax.f32 %v805_v37, 0.0 }
 0x1aa   : > { %v883_v63 = vpop.xlane.xlu1 %882  ;;  %v1150_v31 = vor.u32 1.1754944e-38, %v1149_v17  ;;  %vm1148_vm4 = vcmp.eq.f32.partialorder %v1147_v20, 8.507059e+37 }
 0x1ab   : > { %v980_v1 = vadd.f32 %v3021_v25, %v883_v63  ;;  %v874_v62 = vmul.f32 %v2936_v44, %v838_v46  ;;  %v870_v63 = vmul.f32 %v2936_v44, %v834_v48 }
 0x1ad   : > { %v2580_v7 = vpop.eup %2579  ;;  %v2522_v9 = vmul.f32 -1.442695, %v980_v1  ;;  %v968_v51 = vsel %vm464_vm0, %v874_v62, 0.0  ;;  %v956_v8 = vsel %vm464_vm0, %v870_v63, 0.0 }
 0x1ae   : > { %v2582_v10 = vpop.eup %2581  ;;  %v3056_v11 = vadd.f32 1.0, %v2580_v7 }
 0x1af   : > { %v1139_v13 = vmul.f32 %v2582_v10, %v1106_v56  ;;  %2583 = vpow2.f32 %v2522_v9  ;;  %945 = vadd.xlane.f32.xlu2 %v944_v38  ;;  %951 = vadd.xlane.f32.xlu1 %v950_v5  ;;  %vm1144_vm1 = vweird.f32 %v2582_v10  ;;  %v962_v5 = vsel %vm464_vm0, %v872_v61, 0.0 }
 0x1b0   : > { %2585 = vrcp.f32 %v3056_v11  ;;  %939 = vadd.xlane.f32.xlu0 %v938_v55  ;;  %vm1145_vm3 = vmor %vm1143_vm2, %vm1144_vm1  ;;  %v1164_v52 = vand.u32 2147483648, %v3056_v11  ;;  %vm1158_vm6 = vweird.f32 %v3056_v11  ;;  %v1162_v18 = vand.u32 2147483647, %v3056_v11 }
 0x1b1   : > { %v1140_v14 = vsub.f32 1.0, %v1139_v13  ;;  %v803_v13 = vadd.f32 %v2930_v41, %v3051_v3 }
 0x1b2   : > { %v886_v6 = vpop.xlane.xlu2 %885  ;;  %v1165_v38 = vor.u32 1.1754944e-38, %v1164_v52  ;;  %vm1163_vm8 = vcmp.eq.f32.partialorder %v1162_v18, 8.507059e+37 }
 0x1b3   : > { %v1141_v19 = vmul.f32 %v2582_v10, %v1140_v14  ;;  %v981_v21 = vadd.f32 %v3021_v25, %v886_v6 }
 0x1b5   : > { %v2584_v26 = vpop.eup %2583  ;;  %v1142_v12 = vadd.f32 %v2582_v10, %v1141_v19  ;;  %v2523_v35 = vmul.f32 -1.442695, %v981_v21  ;;  %v837_v19 = vmax.f32 %v803_v13, 0.0 }
 0x1b6   : > { %v2586_v29 = vpop.eup %2585  ;;  %v3068_v32 = vadd.f32 1.0, %v2584_v26 }
 0x1b7   : > { %v1146_v33 = vsel %vm1145_vm3, %v2582_v10, %v1142_v12  ;;  %v1154_v34 = vmul.f32 %v2586_v29, %v3056_v11  ;;  %954 = vadd.xlane.f32.xlu2 %v953_v22  ;;  %960 = vadd.xlane.f32.xlu1 %v959_v23  ;;  %vm1159_vm5 = vweird.f32 %v2586_v29 }
 0x1b8   : > { %v1151_v36 = vsel %vm1148_vm4, %v1150_v31, %v1146_v33  ;;  %2587 = vrcp.f32 %v3068_v32  ;;  %948 = vadd.xlane.f32.xlu0 %v947_v28  ;;  %vm1160_vm7 = vmor %vm1158_vm6, %vm1159_vm5  ;;  %v1179_v3 = vand.u32 2147483648, %v3068_v32  ;;  %vm1173_vm10 = vweird.f32 %v3068_v32 }
 0x1b9   : > { %v1650_v39 = vperm.slane %v1151_v36, 0  ;;  %v1651_v40 = vperm.slane %v1151_v36, 1  ;;  %v1652_v42 = vperm.slane %v1151_v36, 2  ;;  %v1653_v43 = vperm.slane %v1151_v36, 3 }
 0x1ba   : > { %v1654_v45 = vperm.slane %v1151_v36, 4  ;;  %v1155_v54 = vsub.f32 1.0, %v1154_v34  ;;  %2589 = vpow2.f32 %v2523_v35  ;;  %v1655_v30 = vperm.slane %v1151_v36, 5  ;;  %v889_v2 = vpop.xlane.xlu2 %888 }
 0x1bb   : > { %1906 = vst [vmem:[#allocation1] ss:$9 sm:$0xff] %v1650_v39  ;;  %v1656_v49 = vperm.slane %v1151_v36, 6  ;;  %v1657_v56 = vperm.slane %v1151_v36, 7  ;;  %v982_v60 = vadd.f32 %v3021_v25, %v889_v2  ;;  %v1177_v27 = vand.u32 2147483647, %v3068_v32 }
 0x1bc   : > { %1908 = vst [vmem:[#allocation1 + $0x1] ss:$9 sm:$0xff] %v1651_v40  ;;  %v1156_v50 = vmul.f32 %v2586_v29, %v1155_v54  ;;  %v873_v31 = vmul.f32 %v2936_v44, %v837_v19  ;;  %v1180_v33 = vor.u32 1.1754944e-38, %v1179_v3 }
 0x1bd   : > { %1910 = vst [vmem:[#allocation1 + $0x2] ss:$9 sm:$0xff] %v1652_v42  ;;  %v2524_v10 = vmul.f32 -1.442695, %v982_v60  ;;  %vm1178_vm12 = vcmp.eq.f32.partialorder %v1177_v27, 8.507059e+37 }
 0x1be   : > { %v3076_v53 = vpop.eup %2587  ;;  %1912 = vst [vmem:[#allocation1 + $0x3] ss:$9 sm:$0xff] %v1653_v43  ;;  %v1157_v57 = vadd.f32 %v2586_v29, %v1156_v50  ;;  %v965_v35 = vsel %vm464_vm0, %v873_v31, 0.0 }
 0x1bf   : > { %1914 = vst [vmem:[#allocation1 + $0x4] ss:$9 sm:$0xff] %v1654_v45  ;;  %v1169_v59 = vmul.f32 %v3076_v53, %v3068_v32  ;;  %963 = vadd.xlane.f32.xlu2 %v962_v5  ;;  %969 = vadd.xlane.f32.xlu1 %v968_v51  ;;  %vm1174_vm9 = vweird.f32 %v3076_v53 }
 0x1c0   : > { %1916 = vst [vmem:[#allocation1 + $0x5] ss:$9 sm:$0xff] %v1655_v30  ;;  %v2590_v1 = vpop.eup %2589  ;;  %v1161_v4 = vsel %vm1160_vm7, %v2586_v29, %v1157_v57  ;;  %957 = vadd.xlane.f32.xlu0 %v956_v8  ;;  %vm1175_vm11 = vmor %vm1173_vm10, %vm1174_vm9 }
 0x1c1   : > { %1918 = vst [vmem:[#allocation1 + $0x6] ss:$9 sm:$0xff] %v1656_v49  ;;  %v3087_v7 = vadd.f32 1.0, %v2590_v1  ;;  %v1166_v9 = vsel %vm1163_vm8, %v1165_v38, %v1161_v4  ;;  %v1170_v55 = vsub.f32 1.0, %v1169_v59 }
 0x1c2   : > { %1920 = vst [vmem:[#allocation1 + $0x7] ss:$9 sm:$0xff] %v1657_v56  ;;  %v1658_v11 = vperm.slane %v1166_v9, 0  ;;  %v1659_v14 = vperm.slane %v1166_v9, 1  ;;  %v1660_v16 = vperm.slane %v1166_v9, 2  ;;  %v1661_v17 = vperm.slane %v1166_v9, 3  ;;  %v892_v23 = vpop.xlane.xlu1 %891 }
 0x1c3   : > { %2591 = vrcp.f32 %v3087_v7  ;;  %v1171_v15 = vmul.f32 %v3076_v53, %v1170_v55  ;;  %v1662_v6 = vperm.slane %v1166_v9, 4  ;;  %v1663_v21 = vperm.slane %v1166_v9, 5 }
 0x1c4   : > { %2593 = vpow2.f32 %v2524_v10  ;;  %v1664_v41 = vperm.slane %v1166_v9, 6  ;;  %v1665_v12 = vperm.slane %v1166_v9, 7  ;;  %v983_v29 = vadd.f32 %v3021_v25, %v892_v23 }
 0x1c5   : > { %v1172_v22 = vadd.f32 %v3076_v53, %v1171_v15  ;;  %v1194_v2 = vand.u32 2147483648, %v3087_v7  ;;  %vm1188_vm14 = vweird.f32 %v3087_v7  ;;  %v1192_v52 = vand.u32 2147483647, %v3087_v7 }
 0x1c6   : > { %v2525_v36 = vmul.f32 -1.442695, %v983_v29 }
 0x1c7   : > { %v1176_v24 = vsel %vm1175_vm11, %v3076_v53, %v1172_v22  ;;  %v1195_v57 = vor.u32 1.1754944e-38, %v1194_v2  ;;  %vm1193_vm0 = vcmp.eq.f32.partialorder %v1192_v52, 8.507059e+37 }
 0x1c8   : > { %966 = vadd.xlane.f32.xlu0 %v965_v35  ;;  %v1181_v32 = vsel %vm1178_vm12, %v1180_v33, %v1176_v24 }
 0x1c9   : > { %v1921_v58 = vld [vmem:[#allocation1] sm:$0xff]  ;;  %v3095_v20 = vpop.eup %2591  ;;  %v1666_v37 = vperm.slane %v1181_v32, 0  ;;  %v1667_v39 = vperm.slane %v1181_v32, 1  ;;  %v1668_v40 = vperm.slane %v1181_v32, 2  ;;  %v1669_v43 = vperm.slane %v1181_v32, 3 }
 0x1ca   : > { %1922 = vst [vmem:[#allocation1] ss:$9 sm:$0xff] %v1658_v11  ;;  %v2594_v26 = vpop.eup %2593  ;;  %v1184_v28 = vmul.f32 %v3095_v20, %v3087_v7  ;;  %v1670_v45 = vperm.slane %v1181_v32, 4  ;;  %v1671_v47 = vperm.slane %v1181_v32, 5  ;;  %vm1189_vm13 = vweird.f32 %v3095_v20  ;;  %v895_v30 = vpop.xlane.xlu2 %894 }
 0x1cb   : > { %1923 = vst [vmem:[#allocation1 + $0x1] ss:$9 sm:$0xff] %v1659_v14  ;;  %v3107_v34 = vadd.f32 1.0, %v2594_v26  ;;  %v1672_v46 = vperm.slane %v1181_v32, 6  ;;  %v1673_v50 = vperm.slane %v1181_v32, 7  ;;  %vm1190_vm15 = vmor %vm1188_vm14, %vm1189_vm13  ;;  %v984_v56 = vadd.f32 %v3021_v25, %v895_v30 }
 0x1cc   : > { %1924 = vst [vmem:[#allocation1 + $0x2] ss:$9 sm:$0xff] %v1660_v16  ;;  %v1185_v0 = vsub.f32 1.0, %v1184_v28 }
 0x1cd   : > { %1925 = vst [vmem:[#allocation1 + $0x3] ss:$9 sm:$0xff] %v1661_v17  ;;  %2595 = vrcp.f32 %v3107_v34  ;;  %v2526_v62 = vmul.f32 -1.442695, %v984_v56  ;;  %v1209_v13 = vand.u32 2147483648, %v3107_v34  ;;  %vm1203_vm2 = vweird.f32 %v3107_v34 }
 0x1ce   : > { %1926 = vst [vmem:[#allocation1 + $0x4] ss:$9 sm:$0xff] %v1662_v6  ;;  %v1186_v44 = vmul.f32 %v3095_v20, %v1185_v0  ;;  %2597 = vpow2.f32 %v2525_v36  ;;  %v1207_v16 = vand.u32 2147483647, %v3107_v34 }
 0x1cf   : > { %1927 = vst [vmem:[#allocation1 + $0x5] ss:$9 sm:$0xff] %v1663_v21  ;;  %v1210_v19 = vor.u32 1.1754944e-38, %v1209_v13 }
 0x1d0   : > { %1928 = vst [vmem:[#allocation1 + $0x6] ss:$9 sm:$0xff] %v1664_v41  ;;  %v1187_v48 = vadd.f32 %v3095_v20, %v1186_v44  ;;  %vm1208_vm4 = vcmp.eq.f32.partialorder %v1207_v16, 8.507059e+37 }
 0x1d1   : > { %1929 = vst [vmem:[#allocation1 + $0x7] ss:$9 sm:$0xff] %v1665_v12 }
 0x1d2   : > { %v1191_v18 = vsel %vm1190_vm15, %v3095_v20, %v1187_v48  ;;  %v898_v10 = vpop.xlane.xlu1 %897 }
 0x1d3   : > { %v3112_v54 = vpop.eup %2595  ;;  %v1196_v60 = vsel %vm1193_vm0, %v1195_v57, %v1191_v18  ;;  %v985_v17 = vadd.f32 %v3021_v25, %v898_v10 }
 0x1d4   : > { %v2598_v49 = vpop.eup %2597  ;;  %v1199_v53 = vmul.f32 %v3112_v54, %v3107_v34  ;;  %v1674_v63 = vperm.slane %v1196_v60, 0  ;;  %v1675_v1 = vperm.slane %v1196_v60, 1  ;;  %v1676_v38 = vperm.slane %v1196_v60, 2 }
 0x1d5   : > { %v3123_v59 = vadd.f32 1.0, %v2598_v49  ;;  %v1677_v7 = vperm.slane %v1196_v60, 3  ;;  %v1678_v51 = vperm.slane %v1196_v60, 4  ;;  %v1679_v9 = vperm.slane %v1196_v60, 5 }
 0x1d6   : > { %v1200_v61 = vsub.f32 1.0, %v1199_v53  ;;  %vm1204_vm1 = vweird.f32 %v3112_v54  ;;  %v1680_v11 = vperm.slane %v1196_v60, 6  ;;  %v1681_v15 = vperm.slane %v1196_v60, 7 }
 0x1d7   : > { %2202 = vperm.xlu2 %2572, %v1921_v58   ;;  %2599 = vrcp.f32 %v3123_v59  ;;  %vm1205_vm3 = vmor %vm1203_vm2, %vm1204_vm1  ;;  %v2527_v23 = vmul.f32 -1.442695, %v985_v17  ;;  %v1224_v32 = vand.u32 2147483648, %v3123_v59  ;;  %vm1218_vm6 = vweird.f32 %v3123_v59 }
 0x1d8   : > { %v1930_v42 = vld [vmem:[#allocation1] sm:$0xff]  ;;  %v1201_v4 = vmul.f32 %v3112_v54, %v1200_v61  ;;  %2601 = vpow2.f32 %v2526_v62 }
 0x1d9   : > { %1931 = vst [vmem:[#allocation1] ss:$9 sm:$0xff] %v1666_v37  ;;  %v1222_v37 = vand.u32 2147483647, %v3123_v59 }
 0x1da   : > { %1932 = vst [vmem:[#allocation1 + $0x1] ss:$9 sm:$0xff] %v1667_v39  ;;  %v1202_v55 = vadd.f32 %v3112_v54, %v1201_v4  ;;  %v901_v34 = vpop.xlane.xlu2 %900 }
 0x1db   : > { %1933 = vst [vmem:[#allocation1 + $0x2] ss:$9 sm:$0xff] %v1668_v40  ;;  %v986_v44 = vadd.f32 %v3021_v25, %v901_v34  ;;  %vm1223_vm8 = vcmp.eq.f32.partialorder %v1222_v37, 8.507059e+37 }
 0x1dc   : > { %1934 = vst [vmem:[#allocation1 + $0x3] ss:$9 sm:$0xff] %v1669_v43  ;;  %2205 = vperm.xlu0 %2571, %v1930_v42   ;;  %v1206_v6 = vsel %vm1205_vm3, %v3112_v54, %v1202_v55  ;;  %v1225_v42 = vor.u32 1.1754944e-38, %v1224_v32 }
 0x1dd   : > { %1935 = vst [vmem:[#allocation1 + $0x4] ss:$9 sm:$0xff] %v1670_v45  ;;  %v3127_v8 = vpop.eup %2599  ;;  %v1211_v21 = vsel %vm1208_vm4, %v1210_v19, %v1206_v6 }
 0x1de   : > { %1936 = vst [vmem:[#allocation1 + $0x5] ss:$9 sm:$0xff] %v1671_v47  ;;  %v2602_v14 = vpop.eup %2601  ;;  %v1214_v58 = vmul.f32 %v3127_v8, %v3123_v59  ;;  %v1682_v41 = vperm.slane %v1211_v21, 0  ;;  %v1683_v3 = vperm.slane %v1211_v21, 1  ;;  %v1684_v12 = vperm.slane %v1211_v21, 2 }
 0x1df   : > { %1937 = vst [vmem:[#allocation1 + $0x6] ss:$9 sm:$0xff] %v1672_v46  ;;  %v3138_v20 = vadd.f32 1.0, %v2602_v14  ;;  %v1685_v28 = vperm.slane %v1211_v21, 3  ;;  %v1686_v29 = vperm.slane %v1211_v21, 4  ;;  %v1687_v24 = vperm.slane %v1211_v21, 5 }
 0x1e0   : > { %1938 = vst [vmem:[#allocation1 + $0x7] ss:$9 sm:$0xff] %v1673_v50  ;;  %v1215_v22 = vsub.f32 1.0, %v1214_v58  ;;  %vm1219_vm5 = vweird.f32 %v3127_v8  ;;  %v1688_v35 = vperm.slane %v1211_v21, 6  ;;  %v1689_v36 = vperm.slane %v1211_v21, 7 }
 0x1e1   : > { %2603 = vrcp.f32 %v3138_v20  ;;  %vm1220_vm7 = vmor %vm1218_vm6, %vm1219_vm5  ;;  %v2528_v47 = vmul.f32 -1.442695, %v986_v44  ;;  %v1239_v60 = vand.u32 2147483648, %v3138_v20  ;;  %vm1233_vm10 = vweird.f32 %v3138_v20 }
 0x1e2   : > { %v1216_v26 = vmul.f32 %v3127_v8, %v1215_v22  ;;  %2605 = vpow2.f32 %v2527_v23  ;;  %v904_v57 = vpop.xlane.xlu1 %903 }
 0x1e3   : > { %v987_v4 = vadd.f32 %v3021_v25, %v904_v57 }
 0x1e4   : > { %v1217_v33 = vadd.f32 %v3127_v8, %v1216_v26 }
 0x1e6   : > { %v1221_v40 = vsel %vm1220_vm7, %v3127_v8, %v1217_v33 }
 0x1e7   : > { %v1939_v5 = vld [vmem:[#allocation1] sm:$0xff]  ;;  %v3142_v31 = vpop.eup %2603  ;;  %v1226_v45 = vsel %vm1223_vm8, %v1225_v42, %v1221_v40 }
 0x1e8   : > { %1940 = vst [vmem:[#allocation1] ss:$9 sm:$0xff] %v1674_v63  ;;  %2208 = vperm.xlu1 %2573, %v1939_v5   ;;  %v2606_v0 = vpop.eup %2605  ;;  %v1229_v39 = vmul.f32 %v3142_v31, %v3138_v20  ;;  %v1690_v48 = vperm.slane %v1226_v45, 0  ;;  %v1691_v30 = vperm.slane %v1226_v45, 1  ;;  %v1692_v2 = vperm.slane %v1226_v45, 2 }
 0x1e9   : > { %1941 = vst [vmem:[#allocation1 + $0x1] ss:$9 sm:$0xff] %v1675_v1  ;;  %v3153_v43 = vadd.f32 1.0, %v2606_v0  ;;  %v1693_v50 = vperm.slane %v1226_v45, 3  ;;  %v1694_v52 = vperm.slane %v1226_v45, 4  ;;  %v1695_v56 = vperm.slane %v1226_v45, 5 }
 0x1ea   : > { %1942 = vst [vmem:[#allocation1 + $0x2] ss:$9 sm:$0xff] %v1676_v38  ;;  %v1230_v54 = vsub.f32 1.0, %v1229_v39  ;;  %vm1234_vm9 = vweird.f32 %v3142_v31  ;;  %v1696_v59 = vperm.slane %v1226_v45, 6  ;;  %v1697_v62 = vperm.slane %v1226_v45, 7  ;;  %v907_v19 = vpop.xlane.xlu2 %906 }
 0x1eb   : > { %1943 = vst [vmem:[#allocation1 + $0x3] ss:$9 sm:$0xff] %v1677_v7  ;;  %2607 = vrcp.f32 %v3153_v43  ;;  %v1237_v63 = vand.u32 2147483647, %v3138_v20  ;;  %vm1235_vm11 = vmor %vm1233_vm10, %vm1234_vm9  ;;  %v1240_v5 = vor.u32 1.1754944e-38, %v1239_v60  ;;  %v1254_v21 = vand.u32 2147483648, %v3153_v43 }
 0x1ec   : > { %1944 = vst [vmem:[#allocation1 + $0x4] ss:$9 sm:$0xff] %v1678_v51  ;;  %v1231_v46 = vmul.f32 %v3142_v31, %v1230_v54  ;;  %2609 = vpow2.f32 %v2528_v47  ;;  %vm1248_vm14 = vweird.f32 %v3153_v43  ;;  %v988_v26 = vadd.f32 %v3021_v25, %v907_v19 }
 0x1ed   : > { %1945 = vst [vmem:[#allocation1 + $0x5] ss:$9 sm:$0xff] %v1679_v9  ;;  %vm1238_vm12 = vcmp.eq.f32.partialorder %v1237_v63, 8.507059e+37  ;;  %v2529_v9 = vmul.f32 -1.442695, %v987_v4 }
 0x1ee   : > { %1946 = vst [vmem:[#allocation1 + $0x6] ss:$9 sm:$0xff] %v1680_v11  ;;  %v1232_v18 = vadd.f32 %v3142_v31, %v1231_v46 }
 0x1ef   : > { %1947 = vst [vmem:[#allocation1 + $0x7] ss:$9 sm:$0xff] %v1681_v15 }
 0x1f0   : > { %v1236_v38 = vsel %vm1235_vm11, %v3142_v31, %v1232_v18 }
 0x1f1   : > { %v3157_v53 = vpop.eup %2607  ;;  %v1241_v51 = vsel %vm1238_vm12, %v1240_v5, %v1236_v38 }
 0x1f2   : > { %v2610_v61 = vpop.eup %2609  ;;  %v1244_v1 = vmul.f32 %v3157_v53, %v3153_v43  ;;  %v1698_v55 = vperm.slane %v1241_v51, 0  ;;  %v1699_v10 = vperm.slane %v1241_v51, 1  ;;  %v1700_v13 = vperm.slane %v1241_v51, 2  ;;  %v910_v42 = vpop.xlane.xlu1 %909 }
 0x1f3   : > { %v3168_v7 = vadd.f32 1.0, %v2610_v61  ;;  %v1701_v15 = vperm.slane %v1241_v51, 3  ;;  %v1702_v16 = vperm.slane %v1241_v51, 4  ;;  %v1703_v17 = vperm.slane %v1241_v51, 5 }
 0x1f4   : > { %v1245_v8 = vsub.f32 1.0, %v1244_v1  ;;  %vm1249_vm13 = vweird.f32 %v3157_v53  ;;  %v1704_v20 = vperm.slane %v1241_v51, 6  ;;  %v1705_v23 = vperm.slane %v1241_v51, 7 }
 0x1f5   : > { %2611 = vrcp.f32 %v3168_v7  ;;  %vm1250_vm15 = vmor %vm1248_vm14, %vm1249_vm13  ;;  %v1269_v45 = vand.u32 2147483648, %v3168_v7  ;;  %vm1263_vm2 = vweird.f32 %v3168_v7  ;;  %v989_v46 = vadd.f32 %v3021_v25, %v910_v42 }
 0x1f6   : > { %v1948_v27 = vld [vmem:[#allocation1] sm:$0xff]  ;;  %v1246_v11 = vmul.f32 %v3157_v53, %v1245_v8  ;;  %2613 = vpow2.f32 %v2529_v9 }
 0x1f7   : > { %1949 = vst [vmem:[#allocation1] ss:$9 sm:$0xff] %v1682_v41  ;;  %2211 = vperm.xlu0 %2571, %v1948_v27   ;;  %v1252_v41 = vand.u32 2147483647, %v3153_v43  ;;  %v1255_v27 = vor.u32 1.1754944e-38, %v1254_v21 }
 0x1f8   : > { %1950 = vst [vmem:[#allocation1 + $0x1] ss:$9 sm:$0xff] %v1683_v3  ;;  %v1247_v6 = vadd.f32 %v3157_v53, %v1246_v11 }
 0x1f9   : > { %1951 = vst [vmem:[#allocation1 + $0x2] ss:$9 sm:$0xff] %v1684_v12  ;;  %vm1253_vm0 = vcmp.eq.f32.partialorder %v1252_v41, 8.507059e+37 }
 0x1fa   : > { %1952 = vst [vmem:[#allocation1 + $0x3] ss:$9 sm:$0xff] %v1685_v28  ;;  %v1251_v12 = vsel %vm1250_vm15, %v3157_v53, %v1247_v6  ;;  %v913_v5 = vpop.xlane.xlu2 %912 }
 0x1fb   : > { %1953 = vst [vmem:[#allocation1 + $0x4] ss:$9 sm:$0xff] %v1686_v29  ;;  %v3172_v58 = vpop.eup %2611  ;;  %v1256_v29 = vsel %vm1253_vm0, %v1255_v27, %v1251_v12  ;;  %v990_v11 = vadd.f32 %v3021_v25, %v913_v5 }
 0x1fc   : > { %1954 = vst [vmem:[#allocation1 + $0x5] ss:$9 sm:$0xff] %v1687_v24  ;;  %v2614_v22 = vpop.eup %2613  ;;  %v1259_v3 = vmul.f32 %v3172_v58, %v3168_v7  ;;  %v2530_v24 = vmul.f32 -1.442695, %v988_v26  ;;  %v1706_v33 = vperm.slane %v1256_v29, 0  ;;  %v1707_v34 = vperm.slane %v1256_v29, 1 }
 0x1fd   : > { %1955 = vst [vmem:[#allocation1 + $0x6] ss:$9 sm:$0xff] %v1688_v35  ;;  %v3183_v28 = vadd.f32 1.0, %v2614_v22  ;;  %v1708_v32 = vperm.slane %v1256_v29, 2  ;;  %v1710_v37 = vperm.slane %v1256_v29, 4  ;;  %v1711_v44 = vperm.slane %v1256_v29, 5 }
 0x1fe   : > { %1956 = vst [vmem:[#allocation1 + $0x7] ss:$9 sm:$0xff] %v1689_v36  ;;  %v1260_v31 = vsub.f32 1.0, %v1259_v3  ;;  %v1709_v36 = vperm.slane %v1256_v29, 3  ;;  %vm1264_vm1 = vweird.f32 %v3172_v58  ;;  %v1712_v43 = vperm.slane %v1256_v29, 6 }
 0x1ff   : > { %2615 = vrcp.f32 %v3183_v28  ;;  %v1713_v47 = vperm.slane %v1256_v29, 7  ;;  %vm1265_vm3 = vmor %vm1263_vm2, %vm1264_vm1  ;;  %v1284_v51 = vand.u32 2147483648, %v3183_v28  ;;  %vm1278_vm6 = vweird.f32 %v3183_v28 }
 0x200   : > { %v1261_v35 = vmul.f32 %v3172_v58, %v1260_v31  ;;  %2617 = vpow2.f32 %v2530_v24 }
 0x202   : > { %v1262_v40 = vadd.f32 %v3172_v58, %v1261_v35  ;;  %v916_v27 = vpop.xlane.xlu1 %915 }
 0x203   : > { %v991_v35 = vadd.f32 %v3021_v25, %v916_v27 }
 0x205   : > { %v1957_v49 = vld [vmem:[#allocation1] sm:$0xff]  ;;  %v3187_v39 = vpop.eup %2615 }
 0x206   : > { %1958 = vst [vmem:[#allocation1] ss:$9 sm:$0xff] %v1690_v48  ;;  %2214 = vperm.xlu2 %2572, %v1957_v49   ;;  %v2618_v54 = vpop.eup %2617  ;;  %v1267_v48 = vand.u32 2147483647, %v3168_v7  ;;  %v1270_v49 = vor.u32 1.1754944e-38, %v1269_v45  ;;  %vm1279_vm5 = vweird.f32 %v3187_v39 }
 0x207   : > { %1959 = vst [vmem:[#allocation1 + $0x1] ss:$9 sm:$0xff] %v1691_v30  ;;  %v1274_v30 = vmul.f32 %v3187_v39, %v3183_v28  ;;  %vm1280_vm7 = vmor %vm1278_vm6, %vm1279_vm5 }
 0x208   : > { %1960 = vst [vmem:[#allocation1 + $0x2] ss:$9 sm:$0xff] %v1692_v2  ;;  %v1266_v2 = vsel %vm1265_vm3, %v3172_v58, %v1262_v40  ;;  %vm1268_vm4 = vcmp.eq.f32.partialorder %v1267_v48, 8.507059e+37 }
 0x209   : > { %1961 = vst [vmem:[#allocation1 + $0x3] ss:$9 sm:$0xff] %v1693_v50  ;;  %v3198_v50 = vadd.f32 1.0, %v2618_v54  ;;  %v1275_v53 = vsub.f32 1.0, %v1274_v30 }
 0x20a   : > { %1962 = vst [vmem:[#allocation1 + $0x4] ss:$9 sm:$0xff] %v1694_v52  ;;  %v1271_v52 = vsel %vm1268_vm4, %v1270_v49, %v1266_v2  ;;  %v919_v49 = vpop.xlane.xlu2 %918 }
 0x20b   : > { %1963 = vst [vmem:[#allocation1 + $0x5] ss:$9 sm:$0xff] %v1695_v56  ;;  %v2531_v56 = vmul.f32 -1.442695, %v989_v46  ;;  %2619 = vrcp.f32 %v3198_v50  ;;  %v1714_v18 = vperm.slane %v1271_v52, 0  ;;  %v1715_v57 = vperm.slane %v1271_v52, 1 }
 0x20c   : > { %1964 = vst [vmem:[#allocation1 + $0x6] ss:$9 sm:$0xff] %v1696_v59  ;;  %v1276_v59 = vmul.f32 %v3187_v39, %v1275_v53  ;;  %v1716_v60 = vperm.slane %v1271_v52, 2  ;;  %v1718_v63 = vperm.slane %v1271_v52, 4  ;;  %v1719_v4 = vperm.slane %v1271_v52, 5 }
 0x20d   : > { %1965 = vst [vmem:[#allocation1 + $0x7] ss:$9 sm:$0xff] %v1697_v62  ;;  %2621 = vpow2.f32 %v2531_v56  ;;  %v1717_v62 = vperm.slane %v1271_v52, 3  ;;  %v1720_v7 = vperm.slane %v1271_v52, 6  ;;  %v1721_v9 = vperm.slane %v1271_v52, 7 }
 0x20e   : > { %v1277_v38 = vadd.f32 %v3187_v39, %v1276_v59  ;;  %v1299_v29 = vand.u32 2147483648, %v3198_v50  ;;  %vm1293_vm10 = vweird.f32 %v3198_v50  ;;  %v992_v59 = vadd.f32 %v3021_v25, %v919_v49 }
 0x211   : > { %v3202_v1 = vpop.eup %2619 }
 0x212   : > { %vm1294_vm9 = vweird.f32 %v3202_v1 }
 0x213   : > { %v2622_v8 = vpop.eup %2621  ;;  %vm1295_vm11 = vmor %vm1293_vm10, %vm1294_vm9 }
 0x214   : > { %v1966_v14 = vld [vmem:[#allocation1] sm:$0xff] }
 0x215   : > { %1967 = vst [vmem:[#allocation1] ss:$9 sm:$0xff] %v1698_v55  ;;  %2217 = vperm.xlu0 %2571, %v1966_v14   ;;  %v1282_v55 = vand.u32 2147483647, %v3183_v28  ;;  %v1285_v14 = vor.u32 1.1754944e-38, %v1284_v51 }
 0x216   : > { %1968 = vst [vmem:[#allocation1 + $0x1] ss:$9 sm:$0xff] %v1699_v10  ;;  %v1289_v10 = vmul.f32 %v3202_v1, %v3198_v50 }
 0x217   : > { %1969 = vst [vmem:[#allocation1 + $0x2] ss:$9 sm:$0xff] %v1700_v13  ;;  %v1281_v13 = vsel %vm1280_vm7, %v3187_v39, %v1277_v38  ;;  %vm1283_vm8 = vcmp.eq.f32.partialorder %v1282_v55, 8.507059e+37 }
 0x218   : > { %1970 = vst [vmem:[#allocation1 + $0x3] ss:$9 sm:$0xff] %v1701_v15  ;;  %v3213_v15 = vadd.f32 1.0, %v2622_v8  ;;  %v1290_v58 = vsub.f32 1.0, %v1289_v10 }
 0x219   : > { %1971 = vst [vmem:[#allocation1 + $0x4] ss:$9 sm:$0xff] %v1702_v16  ;;  %v1286_v16 = vsel %vm1283_vm8, %v1285_v14, %v1281_v13  ;;  %v922_v14 = vpop.xlane.xlu0 %921 }
 0x21a   : > { %1972 = vst [vmem:[#allocation1 + $0x5] ss:$9 sm:$0xff] %v1703_v17  ;;  %v2532_v17 = vmul.f32 -1.442695, %v990_v11  ;;  %2623 = vrcp.f32 %v3213_v15  ;;  %v1722_v6 = vperm.slane %v1286_v16, 0  ;;  %v1723_v19 = vperm.slane %v1286_v16, 1 }
 0x21b   : > { %1973 = vst [vmem:[#allocation1 + $0x6] ss:$9 sm:$0xff] %v1704_v20  ;;  %v1291_v20 = vmul.f32 %v3202_v1, %v1290_v58  ;;  %v1724_v21 = vperm.slane %v1286_v16, 2  ;;  %v1726_v41 = vperm.slane %v1286_v16, 4  ;;  %v1727_v26 = vperm.slane %v1286_v16, 5 }
 0x21c   : > { %1974 = vst [vmem:[#allocation1 + $0x7] ss:$9 sm:$0xff] %v1705_v23  ;;  %2625 = vpow2.f32 %v2532_v17  ;;  %v1725_v23 = vperm.slane %v1286_v16, 3  ;;  %v1728_v28 = vperm.slane %v1286_v16, 6  ;;  %v1729_v24 = vperm.slane %v1286_v16, 7 }
 0x21d   : > { %v1292_v12 = vadd.f32 %v3202_v1, %v1291_v20  ;;  %v1314_v52 = vand.u32 2147483648, %v3213_v15  ;;  %vm1308_vm14 = vweird.f32 %v3213_v15  ;;  %v993_v20 = vadd.f32 %v3021_v25, %v922_v14 }
 0x220   : > { %v3217_v3 = vpop.eup %2623 }
 0x221   : > { %vm1309_vm13 = vweird.f32 %v3217_v3 }
 0x222   : > { %v2626_v31 = vpop.eup %2625  ;;  %vm1310_vm15 = vmor %vm1308_vm14, %vm1309_vm13 }
 0x223   : > { %v1975_v0 = vld [vmem:[#allocation1] sm:$0xff] }
 0x224   : > { %1976 = vst [vmem:[#allocation1] ss:$9 sm:$0xff] %v1706_v33  ;;  %2220 = vperm.xlu2 %2572, %v1975_v0   ;;  %v1297_v33 = vand.u32 2147483647, %v3198_v50  ;;  %v1300_v0 = vor.u32 1.1754944e-38, %v1299_v29 }
 0x225   : > { %1977 = vst [vmem:[#allocation1 + $0x1] ss:$9 sm:$0xff] %v1707_v34  ;;  %v1304_v34 = vmul.f32 %v3217_v3, %v3213_v15 }
 0x226   : > { %1978 = vst [vmem:[#allocation1 + $0x2] ss:$9 sm:$0xff] %v1708_v32  ;;  %v1296_v32 = vsel %vm1295_vm11, %v3202_v1, %v1292_v12  ;;  %vm1298_vm12 = vcmp.eq.f32.partialorder %v1297_v33, 8.507059e+37 }
 0x227   : > { %1979 = vst [vmem:[#allocation1 + $0x3] ss:$9 sm:$0xff] %v1709_v36  ;;  %v3228_v36 = vadd.f32 1.0, %v2626_v31  ;;  %v1305_v39 = vsub.f32 1.0, %v1304_v34 }
 0x228   : > { %1980 = vst [vmem:[#allocation1 + $0x4] ss:$9 sm:$0xff] %v1710_v37  ;;  %v1301_v37 = vsel %vm1298_vm12, %v1300_v0, %v1296_v32 }
 0x229   : > { %1981 = vst [vmem:[#allocation1 + $0x5] ss:$9 sm:$0xff] %v1711_v44  ;;  %v2533_v44 = vmul.f32 -1.442695, %v991_v35  ;;  %2627 = vrcp.f32 %v3228_v36  ;;  %v1730_v40 = vperm.slane %v1301_v37, 0  ;;  %v1731_v42 = vperm.slane %v1301_v37, 1 }
 0x22a   : > { %1982 = vst [vmem:[#allocation1 + $0x6] ss:$9 sm:$0xff] %v1712_v43  ;;  %v1306_v43 = vmul.f32 %v3217_v3, %v1305_v39  ;;  %v1732_v45 = vperm.slane %v1301_v37, 2  ;;  %v1734_v48 = vperm.slane %v1301_v37, 4  ;;  %v1735_v46 = vperm.slane %v1301_v37, 5 }
 0x22b   : > { %1983 = vst [vmem:[#allocation1 + $0x7] ss:$9 sm:$0xff] %v1713_v47  ;;  %2629 = vpow2.f32 %v2533_v44  ;;  %v1733_v47 = vperm.slane %v1301_v37, 3  ;;  %v1736_v50 = vperm.slane %v1301_v37, 6  ;;  %v1737_v56 = vperm.slane %v1301_v37, 7 }
 0x22c   : > { %v1307_v2 = vadd.f32 %v3217_v3, %v1306_v43  ;;  %v1329_v16 = vand.u32 2147483648, %v3228_v36  ;;  %vm1323_vm2 = vweird.f32 %v3228_v36 }
 0x22f   : > { %v3232_v30 = vpop.eup %2627 }
 0x230   : > { %vm1324_vm1 = vweird.f32 %v3232_v30 }
 0x231   : > { %v2630_v53 = vpop.eup %2629  ;;  %vm1325_vm3 = vmor %vm1323_vm2, %vm1324_vm1 }
 0x232   : > { %v1984_v61 = vld [vmem:[#allocation1] sm:$0xff] }
 0x233   : > { %1985 = vst [vmem:[#allocation1] ss:$9 sm:$0xff] %v1714_v18  ;;  %2223 = vperm.xlu1 %2573, %v1984_v61   ;;  %v1312_v18 = vand.u32 2147483647, %v3213_v15  ;;  %v1315_v61 = vor.u32 1.1754944e-38, %v1314_v52 }
 0x234   : > { %1986 = vst [vmem:[#allocation1 + $0x1] ss:$9 sm:$0xff] %v1715_v57  ;;  %v1319_v57 = vmul.f32 %v3232_v30, %v3228_v36 }
 0x235   : > { %1987 = vst [vmem:[#allocation1 + $0x2] ss:$9 sm:$0xff] %v1716_v60  ;;  %v1311_v60 = vsel %vm1310_vm15, %v3217_v3, %v1307_v2  ;;  %vm1313_vm0 = vcmp.eq.f32.partialorder %v1312_v18, 8.507059e+37 }
 0x236   : > { %1988 = vst [vmem:[#allocation1 + $0x3] ss:$9 sm:$0xff] %v1717_v62  ;;  %v3243_v62 = vadd.f32 1.0, %v2630_v53  ;;  %v1320_v1 = vsub.f32 1.0, %v1319_v57 }
 0x237   : > { %1989 = vst [vmem:[#allocation1 + $0x4] ss:$9 sm:$0xff] %v1718_v63  ;;  %v1316_v63 = vsel %vm1313_vm0, %v1315_v61, %v1311_v60 }
 0x238   : > { %1990 = vst [vmem:[#allocation1 + $0x5] ss:$9 sm:$0xff] %v1719_v4  ;;  %v2534_v4 = vmul.f32 -1.442695, %v992_v59  ;;  %2631 = vrcp.f32 %v3243_v62  ;;  %v1738_v38 = vperm.slane %v1316_v63, 0  ;;  %v1739_v5 = vperm.slane %v1316_v63, 1 }
 0x239   : > { %1991 = vst [vmem:[#allocation1 + $0x6] ss:$9 sm:$0xff] %v1720_v7  ;;  %v1321_v7 = vmul.f32 %v3232_v30, %v1320_v1  ;;  %v1740_v51 = vperm.slane %v1316_v63, 2  ;;  %v1742_v55 = vperm.slane %v1316_v63, 4  ;;  %v1743_v11 = vperm.slane %v1316_v63, 5 }
 0x23a   : > { %1992 = vst [vmem:[#allocation1 + $0x7] ss:$9 sm:$0xff] %v1721_v9  ;;  %2633 = vpow2.f32 %v2534_v4  ;;  %v1741_v9 = vperm.slane %v1316_v63, 3  ;;  %v1744_v15 = vperm.slane %v1316_v63, 6  ;;  %v1745_v17 = vperm.slane %v1316_v63, 7  ;;  %v928_v4 = vpop.xlane.xlu2 %927 }
 0x23b   : > { %v1322_v13 = vadd.f32 %v3232_v30, %v1321_v7  ;;  %vm1338_vm6 = vweird.f32 %v3243_v62  ;;  %v1342_v44 = vand.u32 2147483647, %v3243_v62 }
 0x23d   : > { %vm1343_vm8 = vcmp.eq.f32.partialorder %v1342_v44, 8.507059e+37 }
 0x23e   : > { %v3247_v10 = vpop.eup %2631 }
 0x23f   : > { %vm1339_vm5 = vweird.f32 %v3247_v10 }
 0x240   : > { %v2634_v58 = vpop.eup %2633  ;;  %vm1340_vm7 = vmor %vm1338_vm6, %vm1339_vm5 }
 0x241   : > { %v1993_v22 = vld [vmem:[#allocation1] sm:$0xff] }
 0x242   : > { %1994 = vst [vmem:[#allocation1] ss:$9 sm:$0xff] %v1722_v6  ;;  %2226 = vperm.xlu0 %2571, %v1993_v22   ;;  %v1327_v6 = vand.u32 2147483647, %v3228_v36  ;;  %v1330_v22 = vor.u32 1.1754944e-38, %v1329_v16  ;;  %v1344_v36 = vand.u32 2147483648, %v3243_v62 }
 0x243   : > { %1995 = vst [vmem:[#allocation1 + $0x1] ss:$9 sm:$0xff] %v1723_v19  ;;  %v1334_v19 = vmul.f32 %v3247_v10, %v3243_v62 }
 0x244   : > { %1996 = vst [vmem:[#allocation1 + $0x2] ss:$9 sm:$0xff] %v1724_v21  ;;  %v1326_v21 = vsel %vm1325_vm3, %v3232_v30, %v1322_v13  ;;  %vm1328_vm4 = vcmp.eq.f32.partialorder %v1327_v6, 8.507059e+37 }
 0x245   : > { %1997 = vst [vmem:[#allocation1 + $0x3] ss:$9 sm:$0xff] %v1725_v23  ;;  %v3258_v23 = vadd.f32 1.0, %v2634_v58  ;;  %v1335_v3 = vsub.f32 1.0, %v1334_v19 }
 0x246   : > { %1998 = vst [vmem:[#allocation1 + $0x4] ss:$9 sm:$0xff] %v1726_v41  ;;  %v1331_v41 = vsel %vm1328_vm4, %v1330_v22, %v1326_v21 }
 0x247   : > { %1999 = vst [vmem:[#allocation1 + $0x5] ss:$9 sm:$0xff] %v1727_v26  ;;  %v2535_v26 = vmul.f32 -1.442695, %v993_v20  ;;  %2635 = vrcp.f32 %v3258_v23  ;;  %v1746_v12 = vperm.slane %v1331_v41, 0  ;;  %v1747_v27 = vperm.slane %v1331_v41, 1 }
 0x248   : > { %2000 = vst [vmem:[#allocation1 + $0x6] ss:$9 sm:$0xff] %v1728_v28  ;;  %v1336_v28 = vmul.f32 %v3247_v10, %v1335_v3  ;;  %v1748_v29 = vperm.slane %v1331_v41, 2  ;;  %v1750_v33 = vperm.slane %v1331_v41, 4  ;;  %v1751_v35 = vperm.slane %v1331_v41, 5 }
 0x249   : > { %2001 = vst [vmem:[#allocation1 + $0x7] ss:$9 sm:$0xff] %v1729_v24  ;;  %2637 = vpow2.f32 %v2535_v26  ;;  %v1749_v24 = vperm.slane %v1331_v41, 3  ;;  %v1752_v0 = vperm.slane %v1331_v41, 6  ;;  %v1753_v39 = vperm.slane %v1331_v41, 7  ;;  %v931_v26 = vpop.xlane.xlu0 %930 }
 0x24a   : > { %v1337_v32 = vadd.f32 %v3247_v10, %v1336_v28  ;;  %v1359_v62 = vand.u32 2147483648, %v3258_v23  ;;  %vm1353_vm10 = vweird.f32 %v3258_v23  ;;  %v1357_v1 = vand.u32 2147483647, %v3258_v23 }
 0x24c   : > { %v1341_v43 = vsel %vm1340_vm7, %v3247_v10, %v1337_v32  ;;  %vm1358_vm12 = vcmp.eq.f32.partialorder %v1357_v1, 8.507059e+37 }
 0x24d   : > { %v3262_v34 = vpop.eup %2635 }
 0x24e   : > { %vm1354_vm9 = vweird.f32 %v3262_v34 }
 0x24f   : > { %v2638_v37 = vpop.eup %2637  ;;  %vm1355_vm11 = vmor %vm1353_vm10, %vm1354_vm9 }
 0x250   : > { %v2002_v54 = vld [vmem:[#allocation1] sm:$0xff] }
 0x251   : > { %2003 = vst [vmem:[#allocation1] ss:$9 sm:$0xff] %v1730_v40  ;;  %2229 = vperm.xlu2 %2572, %v2002_v54   ;;  %v925_v40 = vpop.xlane.xlu1 %924 }
 0x252   : > { %2004 = vst [vmem:[#allocation1 + $0x1] ss:$9 sm:$0xff] %v1731_v42  ;;  %v1349_v42 = vmul.f32 %v3262_v34, %v3258_v23  ;;  %v994_v54 = vadd.f32 %v3021_v25, %v925_v40 }
 0x253   : > { %2005 = vst [vmem:[#allocation1 + $0x2] ss:$9 sm:$0xff] %v1732_v45  ;;  %v1345_v45 = vor.u32 1.1754944e-38, %v1344_v36 }
 0x254   : > { %2006 = vst [vmem:[#allocation1 + $0x3] ss:$9 sm:$0xff] %v1733_v47  ;;  %v3273_v47 = vadd.f32 1.0, %v2638_v37  ;;  %v1350_v30 = vsub.f32 1.0, %v1349_v42 }
 0x255   : > { %2007 = vst [vmem:[#allocation1 + $0x4] ss:$9 sm:$0xff] %v1734_v48  ;;  %v1346_v48 = vsel %vm1343_vm8, %v1345_v45, %v1341_v43 }
 0x256   : > { %2008 = vst [vmem:[#allocation1 + $0x5] ss:$9 sm:$0xff] %v1735_v46  ;;  %v2536_v46 = vmul.f32 -1.442695, %v994_v54  ;;  %2639 = vrcp.f32 %v3273_v47  ;;  %v1754_v2 = vperm.slane %v1346_v48, 0  ;;  %v1755_v49 = vperm.slane %v1346_v48, 1 }
 0x257   : > { %2009 = vst [vmem:[#allocation1 + $0x6] ss:$9 sm:$0xff] %v1736_v50  ;;  %v1351_v50 = vmul.f32 %v3262_v34, %v1350_v30  ;;  %v1756_v52 = vperm.slane %v1346_v48, 2  ;;  %v1758_v18 = vperm.slane %v1346_v48, 4  ;;  %v1759_v59 = vperm.slane %v1346_v48, 5 }
 0x258   : > { %2010 = vst [vmem:[#allocation1 + $0x7] ss:$9 sm:$0xff] %v1737_v56  ;;  %v1757_v56 = vperm.slane %v1346_v48, 3  ;;  %2641 = vpow2.f32 %v2536_v46  ;;  %v1760_v61 = vperm.slane %v1346_v48, 6  ;;  %v1761_v63 = vperm.slane %v1346_v48, 7 }
 0x259   : > { %v1352_v60 = vadd.f32 %v3262_v34, %v1351_v50  ;;  %v1374_v22 = vand.u32 2147483648, %v3273_v47  ;;  %vm1368_vm14 = vweird.f32 %v3273_v47  ;;  %v1372_v3 = vand.u32 2147483647, %v3273_v47 }
 0x25b   : > { %v1356_v7 = vsel %vm1355_vm11, %v3262_v34, %v1352_v60  ;;  %vm1373_vm0 = vcmp.eq.f32.partialorder %v1372_v3, 8.507059e+37 }
 0x25c   : > { %v3277_v57 = vpop.eup %2639 }
 0x25d   : > { %vm1369_vm13 = vweird.f32 %v3277_v57 }
 0x25e   : > { %vm1370_vm15 = vmor %vm1368_vm14, %vm1369_vm13 }
 0x25f   : > { %v2011_v8 = vld [vmem:[#allocation1] sm:$0xff] }
 0x260   : > { %2012 = vst [vmem:[#allocation1] ss:$9 sm:$0xff] %v1738_v38  ;;  %2232 = vperm.xlu1 %2573, %v2011_v8   ;;  %v1364_v38 = vmul.f32 %v3277_v57, %v3273_v47  ;;  %v995_v8 = vadd.f32 %v3021_v25, %v928_v4  ;;  %v934_v47 = vpop.xlane.xlu1 %933 }
 0x261   : > { %2013 = vst [vmem:[#allocation1 + $0x1] ss:$9 sm:$0xff] %v1739_v5  ;;  %v2642_v5 = vpop.eup %2641  ;;  %v997_v50 = vadd.f32 %v3021_v25, %v934_v47 }
 0x262   : > { %2014 = vst [vmem:[#allocation1 + $0x2] ss:$9 sm:$0xff] %v1740_v51  ;;  %v1360_v51 = vor.u32 1.1754944e-38, %v1359_v62  ;;  %v1365_v10 = vsub.f32 1.0, %v1364_v38 }
 0x263   : > { %2015 = vst [vmem:[#allocation1 + $0x3] ss:$9 sm:$0xff] %v1741_v9 }
 0x264   : > { %2016 = vst [vmem:[#allocation1 + $0x4] ss:$9 sm:$0xff] %v1742_v55  ;;  %v1361_v9 = vsel %vm1358_vm12, %v1360_v51, %v1356_v7  ;;  %v3288_v55 = vadd.f32 1.0, %v2642_v5 }
 0x265   : > { %2017 = vst [vmem:[#allocation1 + $0x5] ss:$9 sm:$0xff] %v1743_v11  ;;  %v2537_v11 = vmul.f32 -1.442695, %v995_v8  ;;  %v1762_v13 = vperm.slane %v1361_v9, 0  ;;  %v1763_v14 = vperm.slane %v1361_v9, 1  ;;  %v937_v8 = vpop.xlane.xlu2 %936 }
 0x266   : > { %2018 = vst [vmem:[#allocation1 + $0x6] ss:$9 sm:$0xff] %v1744_v15  ;;  %2643 = vrcp.f32 %v3288_v55  ;;  %v1366_v15 = vmul.f32 %v3277_v57, %v1365_v10  ;;  %v1764_v16 = vperm.slane %v1361_v9, 2  ;;  %v1766_v6 = vperm.slane %v1361_v9, 4 }
 0x267   : > { %2019 = vst [vmem:[#allocation1 + $0x7] ss:$9 sm:$0xff] %v1745_v17  ;;  %v1765_v17 = vperm.slane %v1361_v9, 3  ;;  %2645 = vpow2.f32 %v2537_v11  ;;  %v1767_v19 = vperm.slane %v1361_v9, 5  ;;  %v1768_v21 = vperm.slane %v1361_v9, 6 }
 0x268   : > { %v1367_v20 = vadd.f32 %v3277_v57, %v1366_v15  ;;  %v1769_v41 = vperm.slane %v1361_v9, 7  ;;  %v1389_v30 = vand.u32 2147483648, %v3288_v55  ;;  %vm1383_vm2 = vweird.f32 %v3288_v55 }
 0x26c   : > { %v2644_v23 = vpop.eup %2643 }
 0x26d   : > { %v1379_v28 = vmul.f32 %v2644_v23, %v3288_v55  ;;  %vm1384_vm1 = vweird.f32 %v2644_v23 }
 0x26e   : > { %v2020_v31 = vld [vmem:[#allocation1] sm:$0xff]  ;;  %vm1385_vm3 = vmor %vm1383_vm2, %vm1384_vm1 }
 0x26f   : > { %2021 = vst [vmem:[#allocation1] ss:$9 sm:$0xff] %v1746_v12  ;;  %2235 = vperm.xlu0 %2571, %v2020_v31   ;;  %v2646_v12 = vpop.eup %2645  ;;  %v996_v31 = vadd.f32 %v3021_v25, %v931_v26  ;;  %v1380_v34 = vsub.f32 1.0, %v1379_v28 }
 0x270   : > { %2022 = vst [vmem:[#allocation1 + $0x1] ss:$9 sm:$0xff] %v1747_v27  ;;  %v1371_v27 = vsel %vm1370_vm15, %v3277_v57, %v1367_v20 }
 0x271   : > { %2023 = vst [vmem:[#allocation1 + $0x2] ss:$9 sm:$0xff] %v1748_v29  ;;  %v1375_v29 = vor.u32 1.1754944e-38, %v1374_v22 }
 0x272   : > { %2024 = vst [vmem:[#allocation1 + $0x3] ss:$9 sm:$0xff] %v1749_v24  ;;  %v3300_v24 = vadd.f32 1.0, %v2646_v12 }
 0x273   : > { %2025 = vst [vmem:[#allocation1 + $0x4] ss:$9 sm:$0xff] %v1750_v33  ;;  %v1376_v33 = vsel %vm1373_vm0, %v1375_v29, %v1371_v27 }
 0x274   : > { %2026 = vst [vmem:[#allocation1 + $0x5] ss:$9 sm:$0xff] %v1751_v35  ;;  %v2538_v35 = vmul.f32 -1.442695, %v996_v31  ;;  %v1770_v32 = vperm.slane %v1376_v33, 0  ;;  %2647 = vrcp.f32 %v3300_v24  ;;  %v1772_v36 = vperm.slane %v1376_v33, 2  ;;  %v940_v31 = vpop.xlane.xlu0 %939 }
 0x275   : > { %2027 = vst [vmem:[#allocation1 + $0x6] ss:$9 sm:$0xff] %v1752_v0  ;;  %v1771_v0 = vperm.slane %v1376_v33, 1  ;;  %v1773_v44 = vperm.slane %v1376_v33, 3  ;;  %v1774_v40 = vperm.slane %v1376_v33, 4  ;;  %v1775_v42 = vperm.slane %v1376_v33, 5 }
 0x276   : > { %2028 = vst [vmem:[#allocation1 + $0x7] ss:$9 sm:$0xff] %v1753_v39  ;;  %v1381_v39 = vmul.f32 %v2644_v23, %v1380_v34  ;;  %2649 = vpow2.f32 %v2538_v35  ;;  %v1776_v43 = vperm.slane %v1376_v33, 6  ;;  %v1777_v48 = vperm.slane %v1376_v33, 7 }
 0x277   : > { %vm1398_vm6 = vweird.f32 %v3300_v24 }
 0x278   : > { %v1382_v54 = vadd.f32 %v2644_v23, %v1381_v39 }
 0x27a   : > { %v2648_v45 = vpop.eup %2647 }
 0x27b   : > { %vm1399_vm5 = vweird.f32 %v2648_v45 }
 0x27c   : > { %v2650_v46 = vpop.eup %2649  ;;  %vm1400_vm7 = vmor %vm1398_vm6, %vm1399_vm5 }
 0x27d   : > { %v2029_v53 = vld [vmem:[#allocation1] sm:$0xff] }
 0x27e   : > { %2030 = vst [vmem:[#allocation1] ss:$9 sm:$0xff] %v1754_v2  ;;  %2238 = vperm.xlu2 %2572, %v2029_v53   ;;  %v1387_v2 = vand.u32 2147483647, %v3288_v55  ;;  %v1390_v53 = vor.u32 1.1754944e-38, %v1389_v30  ;;  %v1404_v55 = vand.u32 2147483648, %v3300_v24 }
 0x27f   : > { %2031 = vst [vmem:[#allocation1 + $0x1] ss:$9 sm:$0xff] %v1755_v49  ;;  %v1394_v49 = vmul.f32 %v2648_v45, %v3300_v24 }
 0x280   : > { %2032 = vst [vmem:[#allocation1 + $0x2] ss:$9 sm:$0xff] %v1756_v52  ;;  %v1386_v52 = vsel %vm1385_vm3, %v2644_v23, %v1382_v54  ;;  %vm1388_vm4 = vcmp.eq.f32.partialorder %v1387_v2, 8.507059e+37  ;;  %v943_v2 = vpop.xlane.xlu1 %942 }
 0x281   : > { %2033 = vst [vmem:[#allocation1 + $0x3] ss:$9 sm:$0xff] %v1757_v56  ;;  %v3308_v56 = vadd.f32 1.0, %v2650_v46  ;;  %v1395_v57 = vsub.f32 1.0, %v1394_v49 }
 0x282   : > { %2034 = vst [vmem:[#allocation1 + $0x4] ss:$9 sm:$0xff] %v1758_v18  ;;  %v1391_v18 = vsel %vm1388_vm4, %v1390_v53, %v1386_v52 }
 0x283   : > { %2035 = vst [vmem:[#allocation1 + $0x5] ss:$9 sm:$0xff] %v1759_v59  ;;  %v2539_v59 = vmul.f32 -1.442695, %v997_v50  ;;  %2651 = vrcp.f32 %v3308_v56  ;;  %v1778_v60 = vperm.slane %v1391_v18, 0  ;;  %v1396_v62 = vmul.f32 %v2648_v45, %v1395_v57 }
 0x284   : > { %2036 = vst [vmem:[#allocation1 + $0x6] ss:$9 sm:$0xff] %v1760_v61  ;;  %v1779_v61 = vperm.slane %v1391_v18, 1  ;;  %v1780_v1 = vperm.slane %v1391_v18, 2  ;;  %v1781_v4 = vperm.slane %v1391_v18, 3  ;;  %v1782_v38 = vperm.slane %v1391_v18, 4 }
 0x285   : > { %2037 = vst [vmem:[#allocation1 + $0x7] ss:$9 sm:$0xff] %v1761_v63  ;;  %2653 = vpow2.f32 %v2539_v59  ;;  %v1783_v7 = vperm.slane %v1391_v18, 5  ;;  %v1397_v51 = vadd.f32 %v2648_v45, %v1396_v62  ;;  %v1784_v9 = vperm.slane %v1391_v18, 6  ;;  %v3345_v62 = vpop.xlane.xlu0 %948 }
 0x286   : > { %v1785_v11 = vperm.slane %v1391_v18, 7  ;;  %v1419_v33 = vand.u32 2147483648, %v3308_v56  ;;  %vm1413_vm10 = vweird.f32 %v3308_v56 }
 0x289   : > { %v3311_v5 = vpop.eup %2651 }
 0x28a   : > { %v1409_v15 = vmul.f32 %v3311_v5, %v3308_v56  ;;  %vm1414_vm9 = vweird.f32 %v3311_v5 }
 0x28b   : > { %v2654_v10 = vpop.eup %2653  ;;  %vm1415_vm11 = vmor %vm1413_vm10, %vm1414_vm9  ;;  %vm2306_vm10 = vcmask 195712  }
 0x28c   : > { %v2038_v58 = vld [vmem:[#allocation1] sm:$0xff]  ;;  %v1410_v20 = vsub.f32 1.0, %v1409_v15 }
 0x28d   : > { %2039 = vst [vmem:[#allocation1] ss:$9 sm:$0xff] %v1762_v13  ;;  %2241 = vperm.xlu1 %2573, %v2038_v58   ;;  %v1402_v13 = vand.u32 2147483647, %v3300_v24  ;;  %v1405_v58 = vor.u32 1.1754944e-38, %v1404_v55 }
 0x28e   : > { %2040 = vst [vmem:[#allocation1 + $0x1] ss:$9 sm:$0xff] %v1763_v14  ;;  %v998_v14 = vadd.f32 %v3021_v25, %v937_v8 }
 0x28f   : > { %2041 = vst [vmem:[#allocation1 + $0x2] ss:$9 sm:$0xff] %v1764_v16  ;;  %v1401_v16 = vsel %vm1400_vm7, %v2648_v45, %v1397_v51  ;;  %vm1403_vm8 = vcmp.eq.f32.partialorder %v1402_v13, 8.507059e+37 }
 0x290   : > { %2042 = vst [vmem:[#allocation1 + $0x3] ss:$9 sm:$0xff] %v1765_v17  ;;  %v3319_v17 = vadd.f32 1.0, %v2654_v10 }
 0x291   : > { %2043 = vst [vmem:[#allocation1 + $0x4] ss:$9 sm:$0xff] %v1766_v6  ;;  %v1406_v6 = vsel %vm1403_vm8, %v1405_v58, %v1401_v16  ;;  %v3359_v16 = vpop.xlane.xlu0 %957  ;;  %vm2302_vm8 = vcmask 130112  }
 0x292   : > { %2044 = vst [vmem:[#allocation1 + $0x5] ss:$9 sm:$0xff] %v1767_v19  ;;  %v2540_v19 = vmul.f32 -1.442695, %v998_v14  ;;  %2655 = vrcp.f32 %v3319_v17  ;;  %v1787_v22 = vperm.slane %v1406_v6, 1  ;;  %v1788_v3 = vperm.slane %v1406_v6, 2 }
 0x293   : > { %2045 = vst [vmem:[#allocation1 + $0x6] ss:$9 sm:$0xff] %v1768_v21  ;;  %v1786_v21 = vperm.slane %v1406_v6, 0  ;;  %v1789_v26 = vperm.slane %v1406_v6, 3  ;;  %v1790_v12 = vperm.slane %v1406_v6, 4  ;;  %v1791_v28 = vperm.slane %v1406_v6, 5 }
 0x294   : > { %2046 = vst [vmem:[#allocation1 + $0x7] ss:$9 sm:$0xff] %v1769_v41  ;;  %2657 = vpow2.f32 %v2540_v19  ;;  %v1411_v41 = vmul.f32 %v3311_v5, %v1410_v20  ;;  %v1792_v24 = vperm.slane %v1406_v6, 6  ;;  %v1793_v35 = vperm.slane %v1406_v6, 7 }
 0x295   : > { %v1434_v18 = vand.u32 2147483648, %v3319_v17  ;;  %vm1428_vm14 = vweird.f32 %v3319_v17 }
 0x296   : > { %v1412_v29 = vadd.f32 %v3311_v5, %v1411_v41 }
 0x298   : > { %v3323_v27 = vpop.eup %2655 }
 0x299   : > { %vm1429_vm13 = vweird.f32 %v3323_v27 }
 0x29a   : > { %v2658_v34 = vpop.eup %2657  ;;  %vm1430_vm15 = vmor %vm1428_vm14, %vm1429_vm13 }
 0x29b   : > { %v2047_v37 = vld [vmem:[#allocation1] sm:$0xff]  ;;  %v3334_v39 = vadd.f32 1.0, %v2658_v34 }
 0x29c   : > { %2048 = vst [vmem:[#allocation1] ss:$9 sm:$0xff] %v1770_v32  ;;  %2244 = vperm.xlu0 %2571, %v2047_v37   ;;  %v1417_v32 = vand.u32 2147483647, %v3308_v56  ;;  %v1416_v37 = vsel %vm1415_vm11, %v3311_v5, %v1412_v29  ;;  %v946_v56 = vpop.xlane.xlu2 %945  ;;  %vm2310_vm11 = vcmask 261312  }
 0x29d   : > { %2049 = vst [vmem:[#allocation1 + $0x1] ss:$9 sm:$0xff] %v1771_v0  ;;  %v1424_v0 = vmul.f32 %v3323_v27, %v3319_v17  ;;  %2659 = vrcp.f32 %v3334_v39  ;;  %vm1443_vm2 = vweird.f32 %v3334_v39 }
 0x29e   : > { %2050 = vst [vmem:[#allocation1 + $0x2] ss:$9 sm:$0xff] %v1772_v36  ;;  %v999_v36 = vadd.f32 %v3021_v25, %v940_v31  ;;  %vm1418_vm12 = vcmp.eq.f32.partialorder %v1417_v32, 8.507059e+37  ;;  %v3378_v32 = vpop.xlane.xlu0 %966 }
 0x29f   : > { %2051 = vst [vmem:[#allocation1 + $0x3] ss:$9 sm:$0xff] %v1773_v44  ;;  %v1420_v44 = vor.u32 1.1754944e-38, %v1419_v33 }
 0x2a0   : > { %2052 = vst [vmem:[#allocation1 + $0x4] ss:$9 sm:$0xff] %v1774_v40  ;;  %v1425_v40 = vsub.f32 1.0, %v1424_v0  ;;  %v2297_v0 = vlaneseq }
 0x2a1   : > { %2053 = vst [vmem:[#allocation1 + $0x5] ss:$9 sm:$0xff] %v1775_v42  ;;  %v1421_v42 = vsel %vm1418_vm12, %v1420_v44, %v1416_v37  ;;  %vm2314_vm12 = vcmask 326912  }
 0x2a2   : > { %2054 = vst [vmem:[#allocation1 + $0x6] ss:$9 sm:$0xff] %v1776_v43  ;;  %v2541_v43 = vmul.f32 -1.442695, %v999_v36  ;;  %v1794_v45 = vperm.slane %v1421_v42, 0  ;;  %v1426_v54 = vmul.f32 %v3323_v27, %v1425_v40  ;;  %v1796_v30 = vperm.slane %v1421_v42, 2 }
 0x2a3   : > { %2055 = vst [vmem:[#allocation1 + $0x7] ss:$9 sm:$0xff] %v1777_v48  ;;  %v1795_v48 = vperm.slane %v1421_v42, 1  ;;  %v1797_v46 = vperm.slane %v1421_v42, 3  ;;  %v1798_v49 = vperm.slane %v1421_v42, 4  ;;  %v3338_v50 = vpop.eup %2659  ;;  %v1799_v53 = vperm.slane %v1421_v42, 5 }
 0x2a4   : > { %2661 = vpow2.f32 %v2541_v43  ;;  %v1427_v52 = vadd.f32 %v3323_v27, %v1426_v54  ;;  %v1800_v57 = vperm.slane %v1421_v42, 6  ;;  %v3356_v10 = vpop.xlane.xlu2 %954  ;;  %vm1444_vm1 = vweird.f32 %v3338_v50 }
 0x2a5   : > { %vm1445_vm3 = vmor %vm1443_vm2, %vm1444_vm1  ;;  %v3383_v43 = vand.u32 127, %v2297_v0 }
 0x2aa   : > { %v2056_v63 = vld [vmem:[#allocation1] sm:$0xff]  ;;  %v2662_v59 = vpop.eup %2661 }
 0x2ab   : > { %2057 = vst [vmem:[#allocation1] ss:$9 sm:$0xff] %v1778_v60  ;;  %2247 = vperm.xlu2 %2572, %v2056_v63   ;;  %v1432_v60 = vand.u32 2147483647, %v3319_v17  ;;  %v1439_v63 = vmul.f32 %v3338_v50, %v3334_v39  ;;  %v3351_v5 = vadd.f32 1.0, %v2662_v59  ;;  %v1002_v59 = vadd.f32 %v3021_v25, %v3345_v62 }
 0x2ac   : > { %2058 = vst [vmem:[#allocation1 + $0x1] ss:$9 sm:$0xff] %v1779_v61  ;;  %v1801_v61 = vperm.slane %v1421_v42, 7 }
 0x2ad   : > { %2059 = vst [vmem:[#allocation1 + $0x2] ss:$9 sm:$0xff] %v1780_v1  ;;  %v1000_v1 = vadd.f32 %v3021_v25, %v943_v2  ;;  %vm1433_vm0 = vcmp.eq.f32.partialorder %v1432_v60, 8.507059e+37  ;;  %v1440_v51 = vsub.f32 1.0, %v1439_v63  ;;  %2663 = vrcp.f32 %v3351_v5 }
 0x2ae   : > { %2060 = vst [vmem:[#allocation1 + $0x3] ss:$9 sm:$0xff] %v1781_v4  ;;  %v1431_v4 = vsel %vm1430_vm15, %v3323_v27, %v1427_v52  ;;  %v3392_v2 = vadd.s32 4294967288, %v3383_v43  ;;  %v1464_v52 = vand.u32 2147483648, %v3351_v5  ;;  %vm1458_vm6 = vweird.f32 %v3351_v5 }
 0x2af   : > { %2061 = vst [vmem:[#allocation1 + $0x4] ss:$9 sm:$0xff] %v1782_v38  ;;  %v1435_v38 = vor.u32 1.1754944e-38, %v1434_v18  ;;  %v2542_v8 = vmul.f32 -1.442695, %v1000_v1  ;;  %v1441_v13 = vmul.f32 %v3338_v50, %v1440_v51  ;;  %v3407_v51 = vadd.s32 4294967280, %v3383_v43 }
 0x2b0   : > { %2062 = vst [vmem:[#allocation1 + $0x5] ss:$9 sm:$0xff] %v1783_v7  ;;  %v1462_v18 = vand.u32 2147483647, %v3351_v5  ;;  %v1465_v1 = vor.u32 1.1754944e-38, %v1464_v52 }
 0x2b1   : > { %2063 = vst [vmem:[#allocation1 + $0x6] ss:$9 sm:$0xff] %v1784_v9  ;;  %v1436_v7 = vsel %vm1433_vm0, %v1435_v38, %v1431_v4  ;;  %v3353_v9 = vpop.xlane.xlu1 %951  ;;  %2665 = vpow2.f32 %v2542_v8  ;;  %v1442_v20 = vadd.f32 %v3338_v50, %v1441_v13 }
 0x2b2   : > { %2064 = vst [vmem:[#allocation1 + $0x7] ss:$9 sm:$0xff] %v1785_v11  ;;  %v1802_v55 = vperm.slane %v1436_v7, 0  ;;  %v1803_v11 = vperm.slane %v1436_v7, 1  ;;  %v1804_v15 = vperm.slane %v1436_v7, 2  ;;  %v1805_v58 = vperm.slane %v1436_v7, 3 }
 0x2b3   : > { %v1806_v17 = vperm.slane %v1436_v7, 4  ;;  %v3361_v6 = vpop.eup %2663  ;;  %v1807_v19 = vperm.slane %v1436_v7, 5  ;;  %v1809_v41 = vperm.slane %v1436_v7, 7  ;;  %v1446_v27 = vsel %vm1445_vm3, %v3338_v50, %v1442_v20 }
 0x2b4   : > { %vm1459_vm5 = vweird.f32 %v3361_v6  ;;  %vm1463_vm9 = vcmp.eq.f32.partialorder %v1462_v18, 8.507059e+37 }
 0x2b5   : > { %vm1460_vm7 = vmor %vm1458_vm6, %vm1459_vm5 }
 0x2b9   : > { %v2065_v23 = vld [vmem:[#allocation1] sm:$0xff] }
 0x2ba   : > { %2066 = vst [vmem:[#allocation1] ss:$9 sm:$0xff] %v1786_v21  ;;  %2250 = vperm.xlu1 %2573, %v2065_v23   ;;  %v1808_v21 = vperm.slane %v1436_v7, 6  ;;  %v2666_v23 = vpop.eup %2665  ;;  %v2544_v7 = vmul.f32 -1.442695, %v1002_v59 }
 0x2bb   : > { %2067 = vst [vmem:[#allocation1 + $0x1] ss:$9 sm:$0xff] %v1787_v22  ;;  %v1449_v22 = vand.u32 2147483648, %v3334_v39  ;;  %v3374_v31 = vadd.f32 1.0, %v2666_v23 }
 0x2bc   : > { %2068 = vst [vmem:[#allocation1 + $0x2] ss:$9 sm:$0xff] %v1788_v3  ;;  %v1447_v3 = vand.u32 2147483647, %v3334_v39 }
 0x2bd   : > { %2069 = vst [vmem:[#allocation1 + $0x3] ss:$9 sm:$0xff] %v1789_v26  ;;  %v1001_v26 = vadd.f32 %v3021_v25, %v946_v56  ;;  %v1450_v29 = vor.u32 1.1754944e-38, %v1449_v22  ;;  %2667 = vrcp.f32 %v3374_v31  ;;  %vm1473_vm14 = vweird.f32 %v3374_v31 }
 0x2be   : > { %2070 = vst [vmem:[#allocation1 + $0x4] ss:$9 sm:$0xff] %v1790_v12  ;;  %v1454_v12 = vmul.f32 %v3361_v6, %v3351_v5  ;;  %vm1448_vm4 = vcmp.eq.f32.partialorder %v1447_v3, 8.507059e+37 }
 0x2bf   : > { %2071 = vst [vmem:[#allocation1 + $0x5] ss:$9 sm:$0xff] %v1791_v28  ;;  %v3372_v28 = vpop.xlane.xlu1 %960  ;;  %v1451_v33 = vsel %vm1448_vm4, %v1450_v29, %v1446_v27  ;;  %v2543_v34 = vmul.f32 -1.442695, %v1001_v26 }
 0x2c0   : > { %2072 = vst [vmem:[#allocation1 + $0x6] ss:$9 sm:$0xff] %v1792_v24  ;;  %v3376_v24 = vpop.xlane.xlu2 %963  ;;  %v1810_v36 = vperm.slane %v1451_v33, 0  ;;  %v1811_v37 = vperm.slane %v1451_v33, 1  ;;  %v1812_v40 = vperm.slane %v1451_v33, 2  ;;  %v1813_v42 = vperm.slane %v1451_v33, 3 }
 0x2c1   : > { %2073 = vst [vmem:[#allocation1 + $0x7] ss:$9 sm:$0xff] %v1793_v35  ;;  %v1455_v35 = vsub.f32 1.0, %v1454_v12  ;;  %2669 = vpow2.f32 %v2543_v34  ;;  %v1816_v50 = vperm.slane %v1451_v33, 6  ;;  %v1817_v56 = vperm.slane %v1451_v33, 7 }
 0x2c2   : > { %v1479_v34 = vand.u32 2147483648, %v3374_v31 }
 0x2c3   : > { %v1456_v44 = vmul.f32 %v3361_v6, %v1455_v35 }
 0x2c7   : > { %v3385_v54 = vpop.xlane.xlu1 %969 }
 0x2c8   : > { %v2074_v47 = vld [vmem:[#allocation1] sm:$0xff] }
 0x2c9   : > { %2075 = vst [vmem:[#allocation1] ss:$9 sm:$0xff] %v1794_v45  ;;  %2253 = vperm.xlu0 %2571, %v2074_v47   ;;  %v1814_v45 = vperm.slane %v1451_v33, 4  ;;  %v3387_v47 = vpop.eup %2667 }
 0x2ca   : > { %2076 = vst [vmem:[#allocation1 + $0x1] ss:$9 sm:$0xff] %v1795_v48  ;;  %v1815_v48 = vperm.slane %v1451_v33, 5  ;;  %vm1474_vm13 = vweird.f32 %v3387_v47 }
 0x2cb   : > { %2077 = vst [vmem:[#allocation1 + $0x2] ss:$9 sm:$0xff] %v1796_v30  ;;  %v1457_v30 = vadd.f32 %v3361_v6, %v1456_v44  ;;  %vm1475_vm15 = vmor %vm1473_vm14, %vm1474_vm13 }
 0x2cc   : > { %2078 = vst [vmem:[#allocation1 + $0x3] ss:$9 sm:$0xff] %v1797_v46  ;;  %v2203_v46 = vpop.permute.xlu2 %2202 }
 0x2cd   : > { %2079 = vst [vmem:[#allocation1 + $0x4] ss:$9 sm:$0xff] %v1798_v49  ;;  %v2206_v49 = vpop.permute.xlu0 %2205  ;;  %v1461_v60 = vsel %vm1460_vm7, %v3361_v6, %v1457_v30  ;;  %v2299_v4 = vperm.slane %v2203_v46, %v3383_v43 }
 0x2ce   : > { %2080 = vst [vmem:[#allocation1 + $0x5] ss:$9 sm:$0xff] %v1799_v53  ;;  %v2670_v53 = vpop.eup %2669  ;;  %v1466_v5 = vsel %vm1463_vm9, %v1465_v1, %v1461_v60 }
 0x2cf   : > { %2081 = vst [vmem:[#allocation1 + $0x6] ss:$9 sm:$0xff] %v1800_v57  ;;  %v1469_v57 = vmul.f32 %v3387_v47, %v3374_v31  ;;  %v3403_v63 = vadd.f32 1.0, %v2670_v53  ;;  %v2209_v8 = vpop.permute.xlu1 %2208  ;;  %v1819_v6 = vperm.slane %v1466_v5, 1  ;;  %v1820_v20 = vperm.slane %v1466_v5, 2 }
 0x2d0   : > { %2082 = vst [vmem:[#allocation1 + $0x7] ss:$9 sm:$0xff] %v1801_v61  ;;  %v2301_v61 = vperm.slane %v2206_v49, %v3392_v2  ;;  %v1821_v22 = vperm.slane %v1466_v5, 3  ;;  %v1822_v3 = vperm.slane %v1466_v5, 4  ;;  %v1823_v29 = vperm.slane %v1466_v5, 5 }
 0x2d1   : > { %v1470_v38 = vsub.f32 1.0, %v1469_v57  ;;  %2671 = vrcp.f32 %v3403_v63  ;;  %v1824_v35 = vperm.slane %v1466_v5, 6  ;;  %vm1488_vm2 = vweird.f32 %v3403_v63 }
 0x2d2   : > { %v2303_v62 = vsel %vm2302_vm8, %v2301_v61, %v2299_v4  ;;  %2673 = vpow2.f32 %v2544_v7  ;;  %v1494_v61 = vand.u32 2147483648, %v3403_v63 }
 0x2d5   : > { %v2212_v13 = vpop.permute.xlu0 %2211 }
 0x2d7   : > { %v2083_v14 = vld [vmem:[#allocation1] sm:$0xff]  ;;  %v3423_v12 = vpop.eup %2671 }
 0x2d8   : > { %2084 = vst [vmem:[#allocation1] ss:$9 sm:$0xff] %v1802_v55  ;;  %2256 = vperm.xlu2 %2572, %v2083_v14   ;;  %v3412_v55 = vadd.s32 4294967264, %v3383_v43  ;;  %v1818_v14 = vperm.slane %v1466_v5, 0  ;;  %v1484_v44 = vmul.f32 %v3423_v12, %v3403_v63  ;;  %vm1489_vm1 = vweird.f32 %v3423_v12 }
 0x2d9   : > { %2085 = vst [vmem:[#allocation1 + $0x1] ss:$9 sm:$0xff] %v1803_v11  ;;  %v3415_v11 = vadd.s32 4294967272, %v3383_v43  ;;  %vm1490_vm3 = vmor %vm1488_vm2, %vm1489_vm1 }
 0x2da   : > { %2086 = vst [vmem:[#allocation1 + $0x2] ss:$9 sm:$0xff] %v1804_v15  ;;  %v2215_v15 = vpop.permute.xlu2 %2214  ;;  %v1485_v46 = vsub.f32 1.0, %v1484_v44 }
 0x2db   : > { %2087 = vst [vmem:[#allocation1 + $0x3] ss:$9 sm:$0xff] %v1805_v58  ;;  %v1471_v58 = vmul.f32 %v3387_v47, %v1470_v38  ;;  %v2313_v23 = vperm.slane %v2215_v15, %v3412_v55  ;;  %v1492_v38 = vand.u32 2147483647, %v3403_v63 }
 0x2dc   : > { %2088 = vst [vmem:[#allocation1 + $0x4] ss:$9 sm:$0xff] %v1806_v17  ;;  %v1486_v52 = vmul.f32 %v3423_v12, %v1485_v46 }
 0x2dd   : > { %2089 = vst [vmem:[#allocation1 + $0x5] ss:$9 sm:$0xff] %v1807_v19  ;;  %v2305_v19 = vperm.slane %v2209_v8, %v3407_v51  ;;  %v1472_v27 = vadd.f32 %v3387_v47, %v1471_v58  ;;  %vm1493_vm4 = vcmp.eq.f32.partialorder %v1492_v38, 8.507059e+37 }
 0x2de   : > { %2090 = vst [vmem:[#allocation1 + $0x6] ss:$9 sm:$0xff] %v1808_v21  ;;  %v2309_v21 = vperm.slane %v2212_v13, %v3415_v11  ;;  %v1487_v59 = vadd.f32 %v3423_v12, %v1486_v52 }
 0x2df   : > { %2091 = vst [vmem:[#allocation1 + $0x7] ss:$9 sm:$0xff] %v1809_v41  ;;  %v2307_v41 = vsel %vm2306_vm10, %v2305_v19, %v2303_v62  ;;  %v1495_v62 = vor.u32 1.1754944e-38, %v1494_v61 }
 0x2e0   : > { %v2311_v26 = vsel %vm2310_vm11, %v2309_v21, %v2307_v41  ;;  %v1491_v8 = vsel %vm1490_vm3, %v3423_v12, %v1487_v59 }
 0x2e1   : > { %v3428_v33 = vsel %vm2314_vm12, %v2313_v23, %v2311_v26 }
 0x2e6   : > { %v2092_v39 = vld [vmem:[#allocation1] sm:$0xff] }
 0x2e7   : > { %2093 = vst [vmem:[#allocation1] ss:$9 sm:$0xff] %v1810_v36  ;;  %2259 = vperm.xlu1 %2573, %v2092_v39   ;;  %v2674_v36 = vpop.eup %2673  ;;  %v1825_v39 = vperm.slane %v1466_v5, 7  ;;  %v1004_v5 = vadd.f32 %v3021_v25, %v3356_v10 }
 0x2e8   : > { %2094 = vst [vmem:[#allocation1 + $0x1] ss:$9 sm:$0xff] %v1811_v37  ;;  %v1477_v37 = vand.u32 2147483647, %v3374_v31 }
 0x2e9   : > { %2095 = vst [vmem:[#allocation1 + $0x2] ss:$9 sm:$0xff] %v1812_v40  ;;  %v1003_v40 = vadd.f32 %v3021_v25, %v3353_v9  ;;  %v2546_v15 = vmul.f32 -1.442695, %v1004_v5 }
 0x2ea   : > { %2096 = vst [vmem:[#allocation1 + $0x3] ss:$9 sm:$0xff] %v1813_v42  ;;  %v1476_v42 = vsel %vm1475_vm15, %v3387_v47, %v1472_v27  ;;  %vm1478_vm0 = vcmp.eq.f32.partialorder %v1477_v37, 8.507059e+37 }
 0x2eb   : > { %2097 = vst [vmem:[#allocation1 + $0x4] ss:$9 sm:$0xff] %v1814_v45  ;;  %v1480_v45 = vor.u32 1.1754944e-38, %v1479_v34  ;;  %v2545_v31 = vmul.f32 -1.442695, %v1003_v40 }
 0x2ec   : > { %2098 = vst [vmem:[#allocation1 + $0x5] ss:$9 sm:$0xff] %v1815_v48  ;;  %v3438_v48 = vadd.f32 1.0, %v2674_v36 }
 0x2ed   : > { %2099 = vst [vmem:[#allocation1 + $0x6] ss:$9 sm:$0xff] %v1816_v50  ;;  %v1481_v30 = vsel %vm1478_vm0, %v1480_v45, %v1476_v42 }
 0x2ee   : > { %2100 = vst [vmem:[#allocation1 + $0x7] ss:$9 sm:$0xff] %v1817_v56  ;;  %2675 = vrcp.f32 %v3438_v48  ;;  %v1826_v49 = vperm.slane %v1481_v30, 0  ;;  %v1827_v50 = vperm.slane %v1481_v30, 1  ;;  %v1828_v9 = vperm.slane %v1481_v30, 2 }
 0x2ef   : > { %2677 = vpow2.f32 %v2545_v31  ;;  %v1829_v47 = vperm.slane %v1481_v30, 3  ;;  %v1830_v56 = vperm.slane %v1481_v30, 4  ;;  %v1831_v57 = vperm.slane %v1481_v30, 5 }
 0x2f0   : > { %v1832_v60 = vperm.slane %v1481_v30, 6  ;;  %v1833_v4 = vperm.slane %v1481_v30, 7  ;;  %v1509_v26 = vand.u32 2147483648, %v3438_v48  ;;  %vm1503_vm6 = vweird.f32 %v3438_v48 }
 0x2f4   : > { %v3442_v18 = vpop.eup %2675 }
 0x2f5   : > { %v2101_v17 = vld [vmem:[#allocation1] sm:$0xff]  ;;  %v2678_v1 = vpop.eup %2677  ;;  %v1499_v7 = vmul.f32 %v3442_v18, %v3438_v48  ;;  %vm1504_vm5 = vweird.f32 %v3442_v18 }
 0x2f6   : > { %2102 = vst [vmem:[#allocation1] ss:$9 sm:$0xff] %v1818_v14  ;;  %2262 = vperm.xlu0 %2571, %v2101_v17   ;;  %v3454_v13 = vadd.f32 1.0, %v2678_v1  ;;  %v1496_v14 = vsel %vm1493_vm4, %v1495_v62, %v1491_v8  ;;  %vm1505_vm7 = vmor %vm1503_vm6, %vm1504_vm5 }
 0x2f7   : > { %2103 = vst [vmem:[#allocation1 + $0x1] ss:$9 sm:$0xff] %v1819_v6  ;;  %v1500_v58 = vsub.f32 1.0, %v1499_v7  ;;  %v1834_v63 = vperm.slane %v1496_v14, 0  ;;  %v1835_v17 = vperm.slane %v1496_v14, 1  ;;  %v1836_v19 = vperm.slane %v1496_v14, 2 }
 0x2f8   : > { %2104 = vst [vmem:[#allocation1 + $0x2] ss:$9 sm:$0xff] %v1820_v20  ;;  %2679 = vrcp.f32 %v3454_v13  ;;  %v1837_v20 = vperm.slane %v1496_v14, 3  ;;  %v1838_v21 = vperm.slane %v1496_v14, 4  ;;  %v1839_v23 = vperm.slane %v1496_v14, 5 }
 0x2f9   : > { %2105 = vst [vmem:[#allocation1 + $0x3] ss:$9 sm:$0xff] %v1821_v22  ;;  %2681 = vpow2.f32 %v2546_v15  ;;  %v1501_v10 = vmul.f32 %v3442_v18, %v1500_v58  ;;  %v1841_v27 = vperm.slane %v1496_v14, 7  ;;  %vm1518_vm14 = vweird.f32 %v3454_v13 }
 0x2fa   : > { %2106 = vst [vmem:[#allocation1 + $0x4] ss:$9 sm:$0xff] %v1822_v3  ;;  %v1840_v3 = vperm.slane %v1496_v14, 6 }
 0x2fb   : > { %2107 = vst [vmem:[#allocation1 + $0x5] ss:$9 sm:$0xff] %v1823_v29  ;;  %v1502_v41 = vadd.f32 %v3442_v18, %v1501_v10  ;;  %v1507_v29 = vand.u32 2147483647, %v3438_v48 }
 0x2fc   : > { %2108 = vst [vmem:[#allocation1 + $0x6] ss:$9 sm:$0xff] %v1824_v35  ;;  %v1005_v35 = vadd.f32 %v3021_v25, %v3359_v16 }
 0x2fd   : > { %2109 = vst [vmem:[#allocation1 + $0x7] ss:$9 sm:$0xff] %v1825_v39  ;;  %v1506_v36 = vsel %vm1505_vm7, %v3442_v18, %v1502_v41  ;;  %v1510_v39 = vor.u32 1.1754944e-38, %v1509_v26  ;;  %vm1508_vm9 = vcmp.eq.f32.partialorder %v1507_v29, 8.507059e+37  ;;  %v1522_v18 = vand.u32 2147483647, %v3454_v13 }
 0x2fe   : > { %v2680_v22 = vpop.eup %2679  ;;  %v2547_v42 = vmul.f32 -1.442695, %v1005_v35 }
 0x2ff   : > { %v2682_v12 = vpop.eup %2681  ;;  %v1514_v34 = vmul.f32 %v2680_v22, %v3454_v13  ;;  %v1511_v40 = vsel %vm1508_vm9, %v1510_v39, %v1506_v36  ;;  %vm1519_vm13 = vweird.f32 %v2680_v22  ;;  %vm1523_vm0 = vcmp.eq.f32.partialorder %v1522_v18, 8.507059e+37 }
 0x300   : > { %v3467_v37 = vadd.f32 1.0, %v2682_v12  ;;  %v1842_v45 = vperm.slane %v1511_v40, 0  ;;  %v1843_v46 = vperm.slane %v1511_v40, 1  ;;  %v1844_v31 = vperm.slane %v1511_v40, 2  ;;  %vm1520_vm15 = vmor %vm1518_vm14, %vm1519_vm13 }
 0x301   : > { %v1515_v44 = vsub.f32 1.0, %v1514_v34  ;;  %v1845_v16 = vperm.slane %v1511_v40, 3 }
 0x302   : > { %2683 = vrcp.f32 %v3467_v37  ;;  %vm1533_vm2 = vweird.f32 %v3467_v37 }
 0x303   : > { %v1516_v48 = vmul.f32 %v2680_v22, %v1515_v44  ;;  %2685 = vpow2.f32 %v2547_v42 }
 0x304   : > { %v2110_v53 = vld [vmem:[#allocation1] sm:$0xff] }
 0x305   : > { %2111 = vst [vmem:[#allocation1] ss:$9 sm:$0xff] %v1826_v49  ;;  %2265 = vperm.xlu2 %2572, %v2110_v53   ;;  %v1846_v49 = vperm.slane %v1511_v40, 4  ;;  %v1517_v52 = vadd.f32 %v2680_v22, %v1516_v48  ;;  %v1847_v53 = vperm.slane %v1511_v40, 5 }
 0x306   : > { %2112 = vst [vmem:[#allocation1 + $0x1] ss:$9 sm:$0xff] %v1827_v50 }
 0x307   : > { %2113 = vst [vmem:[#allocation1 + $0x2] ss:$9 sm:$0xff] %v1828_v9  ;;  %v1524_v9 = vand.u32 2147483648, %v3454_v13  ;;  %v1521_v61 = vsel %vm1520_vm15, %v2680_v22, %v1517_v52  ;;  %v1537_v22 = vand.u32 2147483647, %v3467_v37  ;;  %v1008_v52 = vadd.f32 %v3021_v25, %v3378_v32 }
 0x308   : > { %2114 = vst [vmem:[#allocation1 + $0x3] ss:$9 sm:$0xff] %v1829_v47  ;;  %v2684_v50 = vpop.eup %2683  ;;  %v1848_v47 = vperm.slane %v1511_v40, 6 }
 0x309   : > { %2115 = vst [vmem:[#allocation1 + $0x4] ss:$9 sm:$0xff] %v1830_v56  ;;  %v2686_v56 = vpop.eup %2685  ;;  %v1529_v59 = vmul.f32 %v2684_v50, %v3467_v37  ;;  %v1525_v1 = vor.u32 1.1754944e-38, %v1524_v9  ;;  %vm1534_vm1 = vweird.f32 %v2684_v50  ;;  %vm1538_vm4 = vcmp.eq.f32.partialorder %v1537_v22, 8.507059e+37 }
 0x30a   : > { %2116 = vst [vmem:[#allocation1 + $0x5] ss:$9 sm:$0xff] %v1831_v57  ;;  %v1849_v57 = vperm.slane %v1511_v40, 7  ;;  %vm1535_vm3 = vmor %vm1533_vm2, %vm1534_vm1 }
 0x30b   : > { %2117 = vst [vmem:[#allocation1 + $0x6] ss:$9 sm:$0xff] %v1832_v60  ;;  %v1006_v60 = vadd.f32 %v3021_v25, %v3372_v28  ;;  %v1526_v38 = vsel %vm1523_vm0, %v1525_v1, %v1521_v61  ;;  %v1530_v5 = vsub.f32 1.0, %v1529_v59 }
 0x30c   : > { %2118 = vst [vmem:[#allocation1 + $0x7] ss:$9 sm:$0xff] %v1833_v4  ;;  %v3476_v4 = vadd.f32 1.0, %v2686_v56  ;;  %v1850_v8 = vperm.slane %v1526_v38, 0  ;;  %v1851_v62 = vperm.slane %v1526_v38, 1  ;;  %v1852_v15 = vperm.slane %v1526_v38, 2 }
 0x30d   : > { %v2548_v7 = vmul.f32 -1.442695, %v1006_v60  ;;  %v1531_v13 = vmul.f32 %v2684_v50, %v1530_v5  ;;  %v1853_v28 = vperm.slane %v1526_v38, 3  ;;  %v1854_v58 = vperm.slane %v1526_v38, 4 }
 0x30e   : > { %2687 = vrcp.f32 %v3476_v4  ;;  %v1856_v10 = vperm.slane %v1526_v38, 6  ;;  %vm1548_vm6 = vweird.f32 %v3476_v4 }
 0x30f   : > { %2689 = vpow2.f32 %v2548_v7 }
 0x313   : > { %v2119_v6 = vld [vmem:[#allocation1] sm:$0xff] }
 0x314   : > { %2120 = vst [vmem:[#allocation1] ss:$9 sm:$0xff] %v1834_v63  ;;  %2268 = vperm.xlu1 %2573, %v2119_v6   ;;  %v3479_v63 = vpop.eup %2687  ;;  %v1532_v6 = vadd.f32 %v2684_v50, %v1531_v13 }
 0x315   : > { %2121 = vst [vmem:[#allocation1 + $0x1] ss:$9 sm:$0xff] %v1835_v17  ;;  %v1855_v17 = vperm.slane %v1526_v38, 5  ;;  %v1544_v41 = vmul.f32 %v3479_v63, %v3476_v4  ;;  %vm1549_vm5 = vweird.f32 %v3479_v63 }
 0x316   : > { %2122 = vst [vmem:[#allocation1 + $0x2] ss:$9 sm:$0xff] %v1836_v19  ;;  %v1539_v19 = vand.u32 2147483648, %v3467_v37  ;;  %vm1550_vm7 = vmor %vm1548_vm6, %vm1549_vm5 }
 0x317   : > { %2123 = vst [vmem:[#allocation1 + $0x3] ss:$9 sm:$0xff] %v1837_v20  ;;  %v2690_v20 = vpop.eup %2689  ;;  %v1545_v34 = vsub.f32 1.0, %v1544_v41 }
 0x318   : > { %2124 = vst [vmem:[#allocation1 + $0x4] ss:$9 sm:$0xff] %v1838_v21  ;;  %v1857_v21 = vperm.slane %v1526_v38, 7  ;;  %v1540_v26 = vor.u32 1.1754944e-38, %v1539_v19  ;;  %v3488_v12 = vadd.f32 1.0, %v2690_v20 }
 0x319   : > { %2125 = vst [vmem:[#allocation1 + $0x5] ss:$9 sm:$0xff] %v1839_v23  ;;  %v1007_v23 = vadd.f32 %v3021_v25, %v3376_v24  ;;  %v1546_v24 = vmul.f32 %v3479_v63, %v1545_v34 }
 0x31a   : > { %2126 = vst [vmem:[#allocation1 + $0x6] ss:$9 sm:$0xff] %v1840_v3  ;;  %v1536_v3 = vsel %vm1535_vm3, %v2684_v50, %v1532_v6  ;;  %2691 = vrcp.f32 %v3488_v12  ;;  %vm1563_vm14 = vweird.f32 %v3488_v12 }
 0x31b   : > { %2127 = vst [vmem:[#allocation1 + $0x7] ss:$9 sm:$0xff] %v1841_v27  ;;  %v1541_v27 = vsel %vm1538_vm4, %v1540_v26, %v1536_v3  ;;  %v2549_v29 = vmul.f32 -1.442695, %v1007_v23  ;;  %v1547_v48 = vadd.f32 %v3479_v63, %v1546_v24 }
 0x31c   : > { %v1858_v35 = vperm.slane %v1541_v27, 0  ;;  %v1859_v36 = vperm.slane %v1541_v27, 1  ;;  %v1860_v39 = vperm.slane %v1541_v27, 2  ;;  %v1861_v44 = vperm.slane %v1541_v27, 3 }
 0x31d   : > { %2693 = vpow2.f32 %v2549_v29  ;;  %v1862_v40 = vperm.slane %v1541_v27, 4 }
 0x320   : > { %v2692_v42 = vpop.eup %2691 }
 0x321   : > { %v1559_v50 = vmul.f32 %v2692_v42, %v3488_v12  ;;  %vm1564_vm13 = vweird.f32 %v2692_v42 }
 0x322   : > { %v2128_v30 = vld [vmem:[#allocation1] sm:$0xff]  ;;  %vm1565_vm15 = vmor %vm1563_vm14, %vm1564_vm13 }
 0x323   : > { %2129 = vst [vmem:[#allocation1] ss:$9 sm:$0xff] %v1842_v45  ;;  %2271 = vperm.xlu0 %2571, %v2128_v30   ;;  %v1863_v45 = vperm.slane %v1541_v27, 5  ;;  %v1864_v30 = vperm.slane %v1541_v27, 6  ;;  %v1560_v56 = vsub.f32 1.0, %v1559_v50 }
 0x324   : > { %2130 = vst [vmem:[#allocation1 + $0x1] ss:$9 sm:$0xff] %v1843_v46  ;;  %v1554_v46 = vand.u32 2147483648, %v3476_v4 }
 0x325   : > { %2131 = vst [vmem:[#allocation1 + $0x2] ss:$9 sm:$0xff] %v1844_v31  ;;  %v2694_v31 = vpop.eup %2693  ;;  %v1561_v60 = vmul.f32 %v2692_v42, %v1560_v56 }
 0x326   : > { %2132 = vst [vmem:[#allocation1 + $0x3] ss:$9 sm:$0xff] %v1845_v16  ;;  %v1865_v16 = vperm.slane %v1541_v27, 7  ;;  %v3501_v9 = vadd.f32 1.0, %v2694_v31 }
 0x327   : > { %2133 = vst [vmem:[#allocation1 + $0x4] ss:$9 sm:$0xff] %v1846_v49  ;;  %v1552_v49 = vand.u32 2147483647, %v3476_v4  ;;  %v1562_v7 = vadd.f32 %v2692_v42, %v1561_v60 }
 0x328   : > { %2134 = vst [vmem:[#allocation1 + $0x5] ss:$9 sm:$0xff] %v1847_v53  ;;  %v1551_v53 = vsel %vm1550_vm7, %v3479_v63, %v1547_v48  ;;  %2695 = vrcp.f32 %v3501_v9  ;;  %v1009_v63 = vadd.f32 %v3021_v25, %v3385_v54  ;;  %vm1578_vm2 = vweird.f32 %v3501_v9 }
 0x329   : > { %2135 = vst [vmem:[#allocation1 + $0x6] ss:$9 sm:$0xff] %v1848_v47  ;;  %v1555_v47 = vor.u32 1.1754944e-38, %v1554_v46  ;;  %vm1553_vm9 = vcmp.eq.f32.partialorder %v1552_v49, 8.507059e+37  ;;  %v1582_v24 = vand.u32 2147483647, %v3501_v9 }
 0x32a   : > { %2136 = vst [vmem:[#allocation1 + $0x7] ss:$9 sm:$0xff] %v1849_v57  ;;  %v2550_v57 = vmul.f32 -1.442695, %v1008_v52 }
 0x32b   : > { %v1556_v18 = vsel %vm1553_vm9, %v1555_v47, %v1551_v53  ;;  %vm1583_vm4 = vcmp.eq.f32.partialorder %v1582_v24, 8.507059e+37 }
 0x32c   : > { %v1866_v59 = vperm.slane %v1556_v18, 0  ;;  %v1867_v61 = vperm.slane %v1556_v18, 1  ;;  %2697 = vpow2.f32 %v2550_v57  ;;  %v1868_v4 = vperm.slane %v1556_v18, 2 }
 0x32d   : > { %v1869_v32 = vperm.slane %v1556_v18, 3  ;;  %v1870_v38 = vperm.slane %v1556_v18, 4  ;;  %v1872_v13 = vperm.slane %v1556_v18, 6 }
 0x32e   : > { %v2696_v5 = vpop.eup %2695 }
 0x32f   : > { %vm1579_vm1 = vweird.f32 %v2696_v5 }
 0x330   : > { %vm1580_vm3 = vmor %vm1578_vm2, %vm1579_vm1  ;;  %vm2318_vm1 = vcmask 392512   ;;  %vm2338_vm2 = vcmask 720512  }
 0x331   : > { %v2137_v14 = vld [vmem:[#allocation1] sm:$0xff] }
 0x332   : > { %2138 = vst [vmem:[#allocation1] ss:$9 sm:$0xff] %v1850_v8  ;;  %2274 = vperm.xlu2 %2572, %v2137_v14   ;;  %v1871_v8 = vperm.slane %v1556_v18, 5  ;;  %v2698_v14 = vpop.eup %2697 }
 0x333   : > { %2139 = vst [vmem:[#allocation1 + $0x1] ss:$9 sm:$0xff] %v1851_v62  ;;  %v1569_v62 = vand.u32 2147483648, %v3488_v12 }
 0x334   : > { %2140 = vst [vmem:[#allocation1 + $0x2] ss:$9 sm:$0xff] %v1852_v15  ;;  %v1567_v15 = vand.u32 2147483647, %v3488_v12 }
 0x335   : > { %2141 = vst [vmem:[#allocation1 + $0x3] ss:$9 sm:$0xff] %v1853_v28  ;;  %v1873_v28 = vperm.slane %v1556_v18, 7  ;;  %v1570_v6 = vor.u32 1.1754944e-38, %v1569_v62 }
 0x336   : > { %2142 = vst [vmem:[#allocation1 + $0x4] ss:$9 sm:$0xff] %v1854_v58  ;;  %v1574_v58 = vmul.f32 %v2696_v5, %v3501_v9  ;;  %vm1568_vm0 = vcmp.eq.f32.partialorder %v1567_v15, 8.507059e+37 }
 0x337   : > { %2143 = vst [vmem:[#allocation1 + $0x5] ss:$9 sm:$0xff] %v1855_v17  ;;  %v1566_v17 = vsel %vm1565_vm15, %v2692_v42, %v1562_v7 }
 0x338   : > { %2144 = vst [vmem:[#allocation1 + $0x6] ss:$9 sm:$0xff] %v1856_v10  ;;  %v3510_v10 = vadd.f32 1.0, %v2698_v14  ;;  %v1571_v19 = vsel %vm1568_vm0, %v1570_v6, %v1566_v17  ;;  %v1575_v20 = vsub.f32 1.0, %v1574_v58 }
 0x339   : > { %2145 = vst [vmem:[#allocation1 + $0x7] ss:$9 sm:$0xff] %v1857_v21  ;;  %v2551_v21 = vmul.f32 -1.442695, %v1009_v63  ;;  %v1874_v22 = vperm.slane %v1571_v19, 0  ;;  %v1875_v23 = vperm.slane %v1571_v19, 1 }
 0x33a   : > { %2699 = vrcp.f32 %v3510_v10  ;;  %v1576_v41 = vmul.f32 %v2696_v5, %v1575_v20  ;;  %v1876_v26 = vperm.slane %v1571_v19, 2  ;;  %v1877_v25 = vperm.slane %v1571_v19, 3 }
 0x33b   : > { %2701 = vpow2.f32 %v2551_v21  ;;  %v1878_v54 = vperm.slane %v1571_v19, 4  ;;  %v1879_v27 = vperm.slane %v1571_v19, 5  ;;  %v1880_v34 = vperm.slane %v1571_v19, 6 }
 0x33c   : > { %v1577_v29 = vadd.f32 %v2696_v5, %v1576_v41  ;;  %v1599_v18 = vand.u32 2147483648, %v3510_v10  ;;  %vm1593_vm6 = vweird.f32 %v3510_v10 }
 0x340   : > { %v2146_v37 = vld [vmem:[#allocation1] sm:$0xff]  ;;  %v2700_v12 = vpop.eup %2699 }
 0x341   : > { %2147 = vst [vmem:[#allocation1] ss:$9 sm:$0xff] %v1858_v35  ;;  %2277 = vperm.xlu1 %2573, %v2146_v37   ;;  %v1584_v35 = vand.u32 2147483648, %v3501_v9  ;;  %v1881_v37 = vperm.slane %v1571_v19, 7  ;;  %vm1594_vm5 = vweird.f32 %v2700_v12 }
 0x342   : > { %2148 = vst [vmem:[#allocation1 + $0x1] ss:$9 sm:$0xff] %v1859_v36  ;;  %v2702_v36 = vpop.eup %2701  ;;  %vm1595_vm7 = vmor %vm1593_vm6, %vm1594_vm5  ;;  %vm2350_vm5 = vcmask 917312   ;;  %vm2354_vm6 = vcmask 982912  }
 0x343   : > { %2149 = vst [vmem:[#allocation1 + $0x2] ss:$9 sm:$0xff] %v1860_v39  ;;  %v1589_v39 = vmul.f32 %v2700_v12, %v3510_v10  ;;  %v3517_v42 = vadd.f32 1.0, %v2702_v36 }
 0x344   : > { %2150 = vst [vmem:[#allocation1 + $0x3] ss:$9 sm:$0xff] %v1861_v44  ;;  %v1581_v44 = vsel %vm1580_vm3, %v2696_v5, %v1577_v29  ;;  %v2218_v29 = vpop.permute.xlu0 %2217  ;;  %vm2342_vm3 = vcmask 786112  }
 0x345   : > { %2151 = vst [vmem:[#allocation1 + $0x4] ss:$9 sm:$0xff] %v1862_v40  ;;  %v1585_v40 = vor.u32 1.1754944e-38, %v1584_v35  ;;  %v1590_v48 = vsub.f32 1.0, %v1589_v39  ;;  %2703 = vrcp.f32 %v3517_v42  ;;  %v1614_v58 = vand.u32 2147483648, %v3517_v42  ;;  %v2224_v35 = vpop.permute.xlu1 %2223 }
 0x346   : > { %2152 = vst [vmem:[#allocation1 + $0x5] ss:$9 sm:$0xff] %v1863_v45  ;;  %vm1608_vm14 = vweird.f32 %v3517_v42  ;;  %v1612_v17 = vand.u32 2147483647, %v3517_v42 }
 0x347   : > { %2153 = vst [vmem:[#allocation1 + $0x6] ss:$9 sm:$0xff] %v1864_v30  ;;  %v1586_v45 = vsel %vm1583_vm4, %v1585_v40, %v1581_v44  ;;  %v1591_v31 = vmul.f32 %v2700_v12, %v1590_v48  ;;  %v1615_v19 = vor.u32 1.1754944e-38, %v1614_v58  ;;  %vm2346_vm4 = vcmask 851712  }
 0x348   : > { %2154 = vst [vmem:[#allocation1 + $0x7] ss:$9 sm:$0xff] %v1865_v16  ;;  %v1882_v30 = vperm.slane %v1586_v45, 0  ;;  %v1883_v46 = vperm.slane %v1586_v45, 1  ;;  %v1884_v49 = vperm.slane %v1586_v45, 2  ;;  %v1885_v50 = vperm.slane %v1586_v45, 3 }
 0x349   : > { %v1886_v52 = vperm.slane %v1586_v45, 4  ;;  %v1887_v9 = vperm.slane %v1586_v45, 5  ;;  %v1592_v47 = vadd.f32 %v2700_v12, %v1591_v31  ;;  %v1888_v56 = vperm.slane %v1586_v45, 6 }
 0x34a   : > { %v1889_v57 = vperm.slane %v1586_v45, 7  ;;  %vm1613_vm0 = vcmp.eq.f32.partialorder %v1612_v17, 8.507059e+37 }
 0x34b   : > { %v2704_v53 = vpop.eup %2703 }
 0x34c   : > { %v1604_v60 = vmul.f32 %v2704_v53, %v3517_v42  ;;  %vm1609_vm13 = vweird.f32 %v2704_v53  ;;  %v2227_v36 = vpop.permute.xlu0 %2226 }
 0x34d   : > { %vm1610_vm15 = vmor %vm1608_vm14, %vm1609_vm13  ;;  %v3529_v24 = vpop.permute.xlu1 %2232  ;;  %vm2397_vm13 = vcmp.lt.s32.totalorder %v2297_v0, 256 }
 0x34f   : > { %v2155_v1 = vld [vmem:[#allocation1] sm:$0xff] }
 0x350   : > { %2280 = vperm.xlu0 %2571, %v2155_v1   ;;  %2156 = vst [vmem:[#allocation1] ss:$9 sm:$0xff] %v1866_v59  ;;  %v1597_v59 = vand.u32 2147483647, %v3510_v10  ;;  %v1600_v1 = vor.u32 1.1754944e-38, %v1599_v18 }
 0x351   : > { %2157 = vst [vmem:[#allocation1 + $0x1] ss:$9 sm:$0xff] %v1867_v61  ;;  %v1596_v61 = vsel %vm1595_vm7, %v2700_v12, %v1592_v47  ;;  %v2316_v47 = vadd.s32 4294967256, %v3383_v43  ;;  %vm2358_vm7 = vcmask 1048512  }
 0x352   : > { %2158 = vst [vmem:[#allocation1 + $0x2] ss:$9 sm:$0xff] %v1868_v4  ;;  %vm1598_vm9 = vcmp.eq.f32.partialorder %v1597_v59, 8.507059e+37  ;;  %v1605_v4 = vsub.f32 1.0, %v1604_v60 }
 0x353   : > { %2159 = vst [vmem:[#allocation1 + $0x3] ss:$9 sm:$0xff] %v1869_v32  ;;  %v1601_v32 = vsel %vm1598_vm9, %v1600_v1, %v1596_v61  ;;  %v2320_v61 = vadd.s32 4294967248, %v3383_v43  ;;  %v2317_v1 = vperm.slane %v2218_v29, %v2316_v47  ;;  %vm2392_vm9 = vcmask 1040384  }
 0x354   : > { %2160 = vst [vmem:[#allocation1 + $0x4] ss:$9 sm:$0xff] %v1870_v38  ;;  %v1890_v38 = vperm.slane %v1601_v32, 0  ;;  %v1606_v5 = vmul.f32 %v2704_v53, %v1605_v4  ;;  %v1891_v7 = vperm.slane %v1601_v32, 1  ;;  %v1892_v62 = vperm.slane %v1601_v32, 2  ;;  %v3531_v39 = vpop.permute.xlu0 %2235 }
 0x355   : > { %2161 = vst [vmem:[#allocation1 + $0x5] ss:$9 sm:$0xff] %v1871_v8  ;;  %v1894_v14 = vperm.slane %v1601_v32, 4  ;;  %v1896_v63 = vperm.slane %v1601_v32, 6  ;;  %v1897_v6 = vperm.slane %v1601_v32, 7  ;;  %v3535_v40 = vpop.permute.xlu1 %2241 }
 0x356   : > { %2162 = vst [vmem:[#allocation1 + $0x6] ss:$9 sm:$0xff] %v1872_v13  ;;  %v1893_v13 = vperm.slane %v1601_v32, 3  ;;  %v1607_v15 = vadd.f32 %v2704_v53, %v1606_v5 }
 0x357   : > { %2163 = vst [vmem:[#allocation1 + $0x7] ss:$9 sm:$0xff] %v1873_v28  ;;  %v1895_v28 = vperm.slane %v1601_v32, 5  ;;  %v2328_v32 = vadd.s32 4294967232, %v3383_v43 }
 0x358   : > { %v1611_v10 = vsel %vm1610_vm15, %v2704_v53, %v1607_v15  ;;  %v2332_v15 = vadd.s32 4294967224, %v3383_v43 }
 0x359   : > { %v1616_v20 = vsel %vm1613_vm0, %v1615_v19, %v1611_v10  ;;  %v2340_v10 = vadd.s32 4294967208, %v3383_v43 }
 0x35a   : > { %v1898_v21 = vperm.slane %v1616_v20, 0  ;;  %v1900_v41 = vperm.slane %v1616_v20, 2  ;;  %v1905_v12 = vperm.slane %v1616_v20, 7 }
 0x35b   : > { %v2341_v29 = vperm.slane %v3531_v39, %v2340_v10 }
 0x35c   : > { %v3537_v42 = vpop.permute.xlu0 %2244 }
 0x35d   : > { %v2251_v48 = vpop.permute.xlu1 %2250 }
 0x35e   : > { %v2164_v3 = vld [vmem:[#allocation1] sm:$0xff] }
 0x35f   : > { %2283 = vperm.xlu2 %2572, %v2164_v3   ;;  %2165 = vst [vmem:[#allocation1] ss:$9 sm:$0xff] %v1874_v22  ;;  %v1899_v22 = vperm.slane %v1616_v20, 1  ;;  %v1901_v3 = vperm.slane %v1616_v20, 3 }
 0x360   : > { %2166 = vst [vmem:[#allocation1 + $0x1] ss:$9 sm:$0xff] %v1875_v23 }
 0x361   : > { %2167 = vst [vmem:[#allocation1 + $0x2] ss:$9 sm:$0xff] %v1876_v26  ;;  %v1902_v26 = vperm.slane %v1616_v20, 4 }
 0x362   : > { %2168 = vst [vmem:[#allocation1 + $0x3] ss:$9 sm:$0xff] %v1877_v25  ;;  %v1903_v25 = vperm.slane %v1616_v20, 5 }
 0x363   : > { %2169 = vst [vmem:[#allocation1 + $0x4] ss:$9 sm:$0xff] %v1878_v54  ;;  %v1904_v54 = vperm.slane %v1616_v20, 6 }
 0x364   : > { %2170 = vst [vmem:[#allocation1 + $0x5] ss:$9 sm:$0xff] %v1879_v27 }
 0x365   : > { %2171 = vst [vmem:[#allocation1 + $0x6] ss:$9 sm:$0xff] %v1880_v34  ;;  %v2221_v34 = vpop.permute.xlu2 %2220  ;;  %v2260_v31 = vpop.permute.xlu1 %2259 }
 0x366   : > { %2172 = vst [vmem:[#allocation1 + $0x7] ss:$9 sm:$0xff] %v1881_v37  ;;  %v2365_v18 = vperm.slane %v2260_v31, %v3415_v11 }
 0x36d   : > { %v2173_v16 = vld [vmem:[#allocation1] sm:$0xff]  ;;  %v3527_v37 = vpop.permute.xlu2 %2229 }
 0x36e   : > { %2286 = vperm.xlu1 %2573, %v2173_v16   ;;  %2174 = vst [vmem:[#allocation1] ss:$9 sm:$0xff] %v1882_v30  ;;  %v2254_v30 = vpop.permute.xlu0 %2253 }
 0x36f   : > { %2175 = vst [vmem:[#allocation1 + $0x1] ss:$9 sm:$0xff] %v1883_v46 }
 0x370   : > { %2176 = vst [vmem:[#allocation1 + $0x2] ss:$9 sm:$0xff] %v1884_v49 }
 0x371   : > { %2177 = vst [vmem:[#allocation1 + $0x3] ss:$9 sm:$0xff] %v1885_v50  ;;  %v2361_v50 = vperm.slane %v2254_v30, %v3392_v2  ;;  %v2324_v2 = vadd.s32 4294967240, %v3383_v43 }
 0x372   : > { %2178 = vst [vmem:[#allocation1 + $0x4] ss:$9 sm:$0xff] %v1886_v52 }
 0x373   : > { %2179 = vst [vmem:[#allocation1 + $0x5] ss:$9 sm:$0xff] %v1887_v9  ;;  %v2360_v9 = vperm.slane %v2251_v48, %v3383_v43 }
 0x374   : > { %2180 = vst [vmem:[#allocation1 + $0x6] ss:$9 sm:$0xff] %v1888_v56 }
 0x375   : > { %2181 = vst [vmem:[#allocation1 + $0x7] ss:$9 sm:$0xff] %v1889_v57  ;;  %v3533_v44 = vpop.permute.xlu2 %2238  ;;  %v2362_v56 = vsel %vm2302_vm8, %v2361_v50, %v2360_v9  ;;  %vm2322_vm8 = vcmask 458112  }
 0x376   : > { %v2263_v16 = vpop.permute.xlu0 %2262 }
 0x377   : > { %v2367_v59 = vperm.slane %v2263_v16, %v3412_v55 }
 0x37c   : > { %v2182_v8 = vld [vmem:[#allocation1] sm:$0xff] }
 0x37d   : > { %2289 = vperm.xlu0 %2571, %v2182_v8   ;;  %2183 = vst [vmem:[#allocation1] ss:$9 sm:$0xff] %v1890_v38  ;;  %v3539_v45 = vpop.permute.xlu2 %2247 }
 0x37e   : > { %2184 = vst [vmem:[#allocation1 + $0x1] ss:$9 sm:$0xff] %v1891_v7 }
 0x37f   : > { %2185 = vst [vmem:[#allocation1 + $0x2] ss:$9 sm:$0xff] %v1892_v62  ;;  %v2321_v62 = vperm.slane %v2221_v34, %v2320_v61  ;;  %v2348_v34 = vadd.s32 4294967192, %v3383_v43 }
 0x380   : > { %2186 = vst [vmem:[#allocation1 + $0x3] ss:$9 sm:$0xff] %v1893_v13  ;;  %v2319_v13 = vsel %vm2318_vm1, %v2317_v1, %v3428_v33 }
 0x381   : > { %2187 = vst [vmem:[#allocation1 + $0x4] ss:$9 sm:$0xff] %v1894_v14  ;;  %v2325_v14 = vperm.slane %v2224_v35, %v2324_v2 }
 0x382   : > { %2188 = vst [vmem:[#allocation1 + $0x5] ss:$9 sm:$0xff] %v1895_v28  ;;  %v2329_v28 = vperm.slane %v2227_v36, %v2328_v32  ;;  %v2352_v36 = vadd.s32 4294967184, %v3383_v43 }
 0x383   : > { %2189 = vst [vmem:[#allocation1 + $0x6] ss:$9 sm:$0xff] %v1896_v63  ;;  %v2336_v63 = vadd.s32 4294967216, %v3383_v43 }
 0x384   : > { %2190 = vst [vmem:[#allocation1 + $0x7] ss:$9 sm:$0xff] %v1897_v6  ;;  %v2323_v6 = vsel %vm2322_vm8, %v2321_v62, %v2319_v13 }
 0x385   : > { %v2257_v46 = vpop.permute.xlu2 %2256 }
 0x386   : > { %v2269_v52 = vpop.permute.xlu1 %2268  ;;  %v2363_v57 = vperm.slane %v2257_v46, %v3407_v51 }
 0x387   : > { %v2371_v7 = vperm.slane %v2269_v52, %v2320_v61 }
 0x388   : > { %v2364_v4 = vsel %vm2306_vm10, %v2363_v57, %v2362_v56  ;;  %vm2326_vm10 = vcmask 523712  }
 0x389   : > { %v2366_v38 = vsel %vm2310_vm11, %v2365_v18, %v2364_v4  ;;  %vm2330_vm11 = vcmask 589312   ;;  %v2327_v33 = vsel %vm2326_vm10, %v2325_v14, %v2323_v6 }
 0x38a   : > { %v2368_v11 = vsel %vm2314_vm12, %v2367_v59, %v2366_v38  ;;  %vm2334_vm12 = vcmask 654912  }
 0x38b   : > { %v2191_v23 = vld [vmem:[#allocation1] sm:$0xff] }
 0x38c   : > { %2292 = vperm.xlu2 %2572, %v2191_v23   ;;  %2192 = vst [vmem:[#allocation1] ss:$9 sm:$0xff] %v1898_v21 }
 0x38d   : > { %2193 = vst [vmem:[#allocation1 + $0x1] ss:$9 sm:$0xff] %v1899_v22  ;;  %v2266_v49 = vpop.permute.xlu2 %2265 }
 0x38e   : > { %2194 = vst [vmem:[#allocation1 + $0x2] ss:$9 sm:$0xff] %v1900_v41  ;;  %v2369_v8 = vperm.slane %v2266_v49, %v2316_v47  ;;  %v2333_v41 = vperm.slane %v3527_v37, %v2332_v15  ;;  %v2349_v49 = vperm.slane %v3535_v40, %v2348_v34  ;;  %v2356_v47 = vadd.s32 4294967176, %v3383_v43 }
 0x38f   : > { %2195 = vst [vmem:[#allocation1 + $0x3] ss:$9 sm:$0xff] %v1901_v3  ;;  %v2331_v3 = vsel %vm2330_vm11, %v2329_v28, %v2327_v33 }
 0x390   : > { %2196 = vst [vmem:[#allocation1 + $0x4] ss:$9 sm:$0xff] %v1902_v26  ;;  %v2370_v58 = vsel %vm2318_vm1, %v2369_v8, %v2368_v11  ;;  %v2335_v30 = vsel %vm2334_vm12, %v2333_v41, %v2331_v3 }
 0x391   : > { %2197 = vst [vmem:[#allocation1 + $0x5] ss:$9 sm:$0xff] %v1903_v25  ;;  %v2372_v17 = vsel %vm2322_vm8, %v2371_v7, %v2370_v58  ;;  %v2344_v25 = vadd.s32 4294967200, %v3383_v43 }
 0x392   : > { %2198 = vst [vmem:[#allocation1 + $0x6] ss:$9 sm:$0xff] %v1904_v54  ;;  %v2337_v54 = vperm.slane %v3529_v24, %v2336_v63 }
 0x393   : > { %2199 = vst [vmem:[#allocation1 + $0x7] ss:$9 sm:$0xff] %v1905_v12  ;;  %v2345_v52 = vperm.slane %v3533_v44, %v2344_v25  ;;  %v2357_v44 = vperm.slane %v3539_v45, %v2356_v47 }
 0x394   : > { %v2339_v24 = vsel %vm2338_vm2, %v2337_v54, %v2335_v30 }
 0x395   : > { %v2272_v53 = vpop.permute.xlu0 %2271  ;;  %v2275_v60 = vpop.permute.xlu2 %2274  ;;  %v2343_v16 = vsel %vm2342_vm3, %v2341_v29, %v2339_v24 }
 0x396   : > { %v2373_v55 = vperm.slane %v2272_v53, %v2324_v2  ;;  %v2375_v22 = vperm.slane %v2275_v60, %v2328_v32  ;;  %v2353_v53 = vperm.slane %v3537_v42, %v2352_v36  ;;  %v2347_v18 = vsel %vm2346_vm4, %v2345_v52, %v2343_v16 }
 0x397   : > { %v2351_v60 = vsel %vm2350_vm5, %v2349_v49, %v2347_v18 }
 0x398   : > { %v2374_v19 = vsel %vm2326_vm10, %v2373_v55, %v2372_v17  ;;  %v2355_v40 = vsel %vm2354_vm6, %v2353_v53, %v2351_v60 }
 0x399   : > { %v2376_v12 = vsel %vm2330_vm11, %v2375_v22, %v2374_v19  ;;  %v2359_v42 = vsel %vm2358_vm7, %v2357_v44, %v2355_v40 }
 0x39a   : > { %v2200_v27 = vld [vmem:[#allocation1] sm:$0xff] }
 0x39b   : > { %2295 = vperm.xlu1 %2573, %v2200_v27  }
 0x3b3   : > { %v2278_v5 = vpop.permute.xlu1 %2277 }
 0x3b4   : > { %v2377_v21 = vperm.slane %v2278_v5, %v2332_v15 }
 0x3b6   : > { %v2378_v35 = vsel %vm2334_vm12, %v2377_v21, %v2376_v12 }
 0x3b9   : > { %v2284_v20 = vpop.permute.xlu2 %2283 }
 0x3ba   : > { %v2381_v46 = vperm.slane %v2284_v20, %v2340_v10 }
 0x3c2   : > { %v2281_v51 = vpop.permute.xlu0 %2280 }
 0x3c3   : > { %v2379_v23 = vperm.slane %v2281_v51, %v2336_v63 }
 0x3c5   : > { %v2380_v37 = vsel %vm2338_vm2, %v2379_v23, %v2378_v35 }
 0x3c6   : > { %v2382_v50 = vsel %vm2342_vm3, %v2381_v46, %v2380_v37 }
 0x3e0   : > { %v2287_v26 = vpop.permute.xlu1 %2286 }
 0x3e1   : > { %v2383_v48 = vperm.slane %v2287_v26, %v2344_v25 }
 0x3e3   : > { %v2384_v9 = vsel %vm2346_vm4, %v2383_v48, %v2382_v50 }
 0x3e6   : > { %v2293_v39 = vpop.permute.xlu2 %2292 }
 0x3e7   : > { %v2387_v57 = vperm.slane %v2293_v39, %v2352_v36 }
 0x3ef   : > { %v2290_v27 = vpop.permute.xlu0 %2289 }
 0x3f0   : > { %v2385_v31 = vperm.slane %v2290_v27, %v2348_v34 }
 0x3f2   : > { %v2386_v56 = vsel %vm2350_vm5, %v2385_v31, %v2384_v9 }
 0x3f3   : > { %v2388_v1 = vsel %vm2354_vm6, %v2387_v57, %v2386_v56 }
 0x40d   : > { %v2296_v59 = vpop.permute.xlu1 %2295 }
 0x40e   : > { %v2389_v61 = vperm.slane %v2296_v59, %v2356_v47 }
 0x410   : > { %v2390_v2 = vsel %vm2358_vm7, %v2389_v61, %v2388_v1 }
 0x411   : > { %v2391_v43 = vrot.slane %v2390_v2, 7 }
 0x413   : > { %v2393_v4 = vsel %vm2392_vm9, %v2359_v42, %v2391_v43 }
 0x414   : > { %2399 = vst.msk [vmem:[%s329_s11] sm:$0x3] %vm2397_vm13, %v2393_v4 }
 0x415 PF: > { %s20_s29 = sadd.s32 1, %s2711_s29  }
 0x416   : > { %p17_p5 = scmp.ge.s32.totalorder %s20_s29, 6  }
 0x418   :  { %19 = sbr.rel (!%p17_p5) target bundleno = 3 (0x3), region = 92 }

</bundles_post_ra>
